<compile_context>
chip_gen: v6e
topology: v6e:2x2x1
jax: 0.10.0
libtpu: 0.0.40
codegen_flags: <defaults>
</compile_context>

<pallas_src>
import functools

import jax
import jax.numpy as jnp
import numpy as np
from jax.experimental import pallas as pl
from jax.experimental.pallas import tpu as pltpu

LANES = 128


# --------------------------------------------------------------------------------------
# tiling helpers
# --------------------------------------------------------------------------------------
def _cdiv(a, b):
    return (a + b - 1) // b


def _round_up(a, m):
    return _cdiv(a, m) * m


def _pick_tile(sb, bytes_per_sprow, target_bytes):
    """# of 128-lane spatial rows per grid step. Always a multiple of 8; prefers an exact
    divisor of sb (so the lane-major view needs no padding copy) near the byte target."""
    tb = int(target_bytes) // max(int(bytes_per_sprow), 1)
    tb = max(8, (tb // 8) * 8)
    if tb >= sb:
        return _round_up(max(sb, 1), 8)          # single block covering the whole extent
    if sb % 8 == 0:
        for cand in range(tb, max(8, tb // 2) - 1, -8):
            if sb % cand == 0:
                return cand                      # no spatial padding at all
    return tb


def _to_lane_major(x, sb_pad, pad_value=0):
    """(..., S) -> (..., SB_pad, 128). A free reshape unless padding is required."""
    lead, s = x.shape[:-1], x.shape[-1]
    total = sb_pad * LANES
    if total != s:
        x = jnp.pad(x, [(0, 0)] * len(lead) + [(0, total - s)], constant_values=pad_value)
    return x.reshape(*lead, sb_pad, LANES)


# --------------------------------------------------------------------------------------
# fused per-level reduction kernel
# --------------------------------------------------------------------------------------
def _fused_loss_kernel(p_ref, ts_ref, po_ref, to_ref, seg_ref, off_ref, *,
                       steps_per_shard, total_steps, eps):
    core = pl.program_id(0)
    step = pl.program_id(1)

    @pl.when(step == 0)
    def _():
        seg_ref[...] = jnp.zeros_like(seg_ref)
        off_ref[...] = jnp.zeros_like(off_ref)

    @pl.when(core * steps_per_shard + step < total_steps)
    def _():
        n, c, tb, _ = p_ref.shape
        coff = po_ref.shape[1]
        g = tb // 8

        def vsum(x):                     # (N, TB, 128) -> (8, 128): vreg-granular adds only
            return jnp.sum(x.reshape(n, g, 8, LANES), axis=(0, 1))

        labels = ts_ref[:, 0].astype(jnp.float32)        # (N, TB, 128); spatial pad = -1

        # ---- segmentation: per-channel Dice sums + BCE sum ---------------------------
        for ci in range(c):
            p = p_ref[:, ci].astype(jnp.float32)         # probabilities in [0, 1]
            oh = (labels == float(ci)).astype(jnp.float32)   # in-register one-hot slice
            ps = jax.nn.sigmoid(p)                       # Dice re-normalizes (torch ref)
            lp = jnp.maximum(jnp.log(p), -100.0)         # torch BCELoss log clamp
            l1p = jnp.maximum(jnp.log(1.0 - p), -100.0)
            bce = -(l1p + oh * (lp - l1p))               # == -(oh*lp + (1-oh)*l1p)
            seg_ref[0, 0 * c + ci] += vsum(ps * oh)      # intersect
            seg_ref[0, 1 * c + ci] += vsum(ps * ps)      # sum sigmoid(p)^2
            seg_ref[0, 2 * c + ci] += vsum(oh)           # one-hot count
            seg_ref[0, 3 * c + ci] += vsum(bce)          # BCE sum

        # ---- offsets: masked SmoothL1 + displacement ----------------------------------
        posf = (labels > 0.0).astype(jnp.float32)        # padding (label -1) excluded
        sl1 = jnp.zeros_like(posf)
        sp2 = jnp.zeros_like(posf)
        st2 = jnp.zeros_like(posf)
        sdot = jnp.zeros_like(posf)
        for ci in range(coff):
            po = po_ref[:, ci].astype(jnp.float32)
            to = to_ref[:, ci].astype(jnp.float32)
            d = po - to
            ad = jnp.abs(d)
            sl1 = sl1 + jnp.where(ad < 1.0, 0.5 * d * d, ad - 0.5)   # SmoothL1, beta=1.0
            sp2 = sp2 + po * po
            st2 = st2 + to * to
            sdot = sdot + po * to
        dot = sdot / ((jnp.sqrt(sp2) + eps) * (jnp.sqrt(st2) + eps))
        off_ref[0, 0] += vsum(sl1 * posf)                # masked SmoothL1 sum
        off_ref[0, 1] += vsum(posf)                      # positive-pixel count
        off_ref[0, 2] += vsum((1.0 - dot * dot) * posf)  # displacement sum


def _fused_stats(pred_seg, target_seg, pred_offset, target_offset, *,
                 eps=1e-6, target_block_bytes=6 << 20):
    n, c, h, w = pred_seg.shape
    tsc = target_seg.shape[1]
    coff = pred_offset.shape[1]
    s = h * w
    sb = _cdiv(s, LANES)

    row_bytes = LANES * n * (
        c * jnp.dtype(pred_seg.dtype).itemsize
        + tsc * jnp.dtype(target_seg.dtype).itemsize
        + coff * (jnp.dtype(pred_offset.dtype).itemsize
                  + jnp.dtype(target_offset.dtype).itemsize))
    tb = _pick_tile(sb, row_bytes, target_block_bytes)
    sb_pad = _round_up(sb, tb)
    pad_elems = sb_pad * LANES - s                      # padded elems per (n, channel)

    total_steps = sb_pad // tb
    num_shards = 2 if total_steps >= 2 else 1           # v7x: one shard per TensorCore
    spp = _cdiv(total_steps, num_shards)
    last = total_steps - 1

    # Free lane-major reshapes (pad only when H*W is not 128*8-aligned).
    p4 = _to_lane_major(pred_seg.reshape(n, c, s), sb_pad, 0)
    ts4 = _to_lane_major(target_seg.reshape(n, tsc, s), sb_pad, -1)   # label pad = -1
    po4 = _to_lane_major(pred_offset.reshape(n, coff, s), sb_pad, 0)
    to4 = _to_lane_major(target_offset.reshape(n, coff, s), sb_pad, 0)

    def in_map(sh, i):
        return (0, 0, jnp.minimum(sh * spp + i, last), 0)

    def out_map(sh, i):
        return (sh, 0, 0, 0)

    step_bytes = tb * row_bytes
    vmem_limit = int(min(56 << 20, max(24 << 20, 2 * step_bytes + (16 << 20))))

    kernel = functools.partial(_fused_loss_kernel, steps_per_shard=spp,
                               total_steps=total_steps, eps=eps)
    seg_acc, off_acc = pl.pallas_call(
        kernel,
        out_shape=(
            jax.ShapeDtypeStruct((num_shards, 4 * c, 8, LANES), jnp.float32),
            jax.ShapeDtypeStruct((num_shards, 3, 8, LANES), jnp.float32),
        ),
        grid_spec=pltpu.PrefetchScalarGridSpec(
            num_scalar_prefetch=0,
            grid=(num_shards, spp),
            in_specs=[
                pl.BlockSpec((n, c, tb, LANES), in_map),
                pl.BlockSpec((n, tsc, tb, LANES), in_map),
                pl.BlockSpec((n, coff, tb, LANES), in_map),
                pl.BlockSpec((n, coff, tb, LANES), in_map),
            ],
            out_specs=[
                pl.BlockSpec((1, 4 * c, 8, LANES), out_map),
                pl.BlockSpec((1, 3, 8, LANES), out_map),
            ],
        ),
        compiler_params=pltpu.CompilerParams(
            dimension_semantics=("parallel", "arbitrary"),
            vmem_limit_bytes=vmem_limit,
        ),
    )(p4, ts4, po4, to4)

    # final tiny reductions in JAX (cross-shard + sublane + lane)
    seg_sums = jnp.sum(seg_acc.reshape(num_shards, 4, c, 8 * LANES), axis=(0, 3))  # (4, C)
    intersect = seg_sums[0]
    psq = seg_sums[1] - 0.25 * n * pad_elems     # padded pred==0 -> sigmoid(0)^2 == 0.25
    tsq = seg_sums[2]
    bce_sum = jnp.sum(seg_sums[3])
    off_sums = jnp.sum(off_acc, axis=(0, 2, 3))  # (3,)
    return intersect, psq, tsq, bce_sum, off_sums[0], off_sums[1], off_sums[2]


# --------------------------------------------------------------------------------------
# loss wrappers (cheap scalar glue in plain JAX)
# --------------------------------------------------------------------------------------
def segment_offset_loss(pred, target, *, alpha=0.5, beta=100.0, bce_w=0.5, dice_w=0.5,
                        dice_eps=1e-6, disp_eps=1e-6, target_block_bytes=6 << 20):
    """JAX/Pallas equivalent of SegmentOffsetLoss.forward for one pyramid level."""
    pred_seg, pred_offset = pred
    target_seg, target_offset = target
    n, c, h, w = pred_seg.shape
    coff = pred_offset.shape[1]

    (intersect, psq, tsq, bce_sum, sl1_sum, pos_cnt, disp_sum) = _fused_stats(
        pred_seg, target_seg, pred_offset, target_offset,
        eps=disp_eps, target_block_bytes=target_block_bytes)

    bce_mean = bce_sum / float(n * c * h * w)
    dice = 2.0 * intersect / jnp.maximum(psq + tsq, dice_eps)
    dice_loss = 1.0 - jnp.mean(dice)
    seg_loss = alpha * (bce_w * bce_mean + dice_w * dice_loss)

    # NOTE: like the PyTorch original, pos_cnt == 0 yields NaN/Inf for these two terms.
    offset_loss = beta * sl1_sum / (float(coff) * pos_cnt)
    displacement = disp_sum / pos_cnt
    return {"seg": seg_loss, "offset": offset_loss, "displacement": displacement}


def segment_offset_loss2(preds, targets, *, alpha=0.5, beta=100.0,
                         target_block_bytes=6 << 20):
    """JAX/Pallas equivalent of SegmentOffsetLoss2.forward.

    Mirrors the original module exactly: it accumulates prefixed entries into a local
    dict but returns only the LAST level's (un-prefixed) loss dict."""
    losses = {}
    loss = None
    for i, (y_pred, y_target) in enumerate(zip(preds, targets)):
        loss = segment_offset_loss(y_pred, y_target, alpha=alpha, beta=beta,
                                   target_block_bytes=target_block_bytes)
        losses.update({f"{i:02d}_" + k: v for k, v in loss.items()})
    return loss


# --------------------------------------------------------------------------------------
# pure-JAX reference (mirrors the PyTorch math) + test harness
# --------------------------------------------------------------------------------------
def _reference_level_loss(pred, target, alpha=0.5, beta=100.0):
    pred_seg, pred_offset = pred
    target_seg, target_offset = target
    n, c, h, w = pred_seg.shape
    coff = pred_offset.shape[1]
    t_seg = target_seg[:, 0:1]                                   # (N, 1, H, W)
    labels = t_seg[:, 0].astype(jnp.int32)
    onehot = jax.nn.one_hot(labels, c, axis=1, dtype=jnp.float32)

    p = pred_seg.astype(jnp.float32)
    lp = jnp.maximum(jnp.log(p), -100.0)
    l1p = jnp.maximum(jnp.log(1.0 - p), -100.0)
    bce = jnp.mean(-(onehot * lp + (1.0 - onehot) * l1p))

    ps = jax.nn.sigmoid(p)
    pc = jnp.transpose(ps, (1, 0, 2, 3)).reshape(c, -1)
    tc = jnp.transpose(onehot, (1, 0, 2, 3)).reshape(c, -1)
    intersect = jnp.sum(pc * tc, axis=-1)
    denom = jnp.maximum(jnp.sum(pc * pc, -1) + jnp.sum(tc * tc, -1), 1e-6)
    dice_loss = 1.0 - jnp.mean(2.0 * intersect / denom)
    seg = alpha * (0.5 * bce + 0.5 * dice_loss)

    pos = (t_seg > 0).astype(jnp.float32)
    d = pred_offset - target_offset
    ad = jnp.abs(d)
    sl1 = jnp.where(ad < 1.0, 0.5 * d * d, ad - 0.5)
    cnt = jnp.sum(pos)
    offset = beta * jnp.sum(sl1 * pos) / (float(coff) * cnt)

    eps = 1e-6
    pn = jnp.linalg.norm(pred_offset, axis=1, keepdims=True) + eps
    tn = jnp.linalg.norm(target_offset, axis=1, keepdims=True) + eps
    dot = jnp.sum((pred_offset / pn) * (target_offset / tn), axis=1, keepdims=True)
    disp = jnp.sum((1.0 - dot * dot) * pos) / cnt
    return {"seg": seg, "offset": offset, "displacement": disp}


if __name__ == "__main__":
    key = jax.random.PRNGKey(0)
    alpha, beta = 0.5, 100.0
    N, C, COFF = 2, 4, 3
    level_shapes = [(16, 16), (48, 64), (8, 16)]      # three pyramid levels (H, W)

    preds, targets = [], []
    for (H, W) in level_shapes:
        key, k1, k2, k3, k4 = jax.random.split(key, 5)
        pred_seg = jax.nn.sigmoid(jax.random.normal(k1, (N, C, H, W), jnp.float32))
        pred_offset = jax.random.normal(k2, (N, COFF, H, W), jnp.float32)
        labels = jax.random.randint(k3, (N, 1, H, W), 0, C).astype(jnp.float32)
        mask_ch = jnp.ones((N, 1, H, W), jnp.float32)            # unused mask channel
        target_seg = jnp.concatenate([labels, mask_ch], axis=1)  # (N, 2, H, W)
        target_offset = jax.random.normal(k4, (N, COFF, H, W), jnp.float32)
        preds.append((pred_seg, pred_offset))
        targets.append((target_seg, target_offset))

    # Per-level checks. The tiny block-byte setting forces the multi-step, two-shard
    # (megacore) accumulation path with a ragged step count on the (48, 64) level.
    for tbb in (6 << 20, 8 << 10):
        for pred, target in zip(preds, targets):
            out = jax.block_until_ready(
                segment_offset_loss(pred, target, alpha=alpha, beta=beta,
                                    target_block_bytes=tbb))
            ref = _reference_level_loss(pred, target, alpha=alpha, beta=beta)
            for k in ("seg", "offset", "displacement"):
                np.testing.assert_allclose(np.asarray(out[k]), np.asarray(ref[k]),
                                           rtol=1e-4, atol=1e-5)

    # Module-level behavior: returns only the LAST pyramid level's loss dict.
    out = jax.block_until_ready(segment_offset_loss2(preds, targets, alpha=alpha, beta=beta))
    ref = _reference_level_loss(preds[-1], targets[-1], alpha=alpha, beta=beta)
    for k in ("seg", "offset", "displacement"):
        np.testing.assert_allclose(np.asarray(out[k]), np.asarray(ref[k]),
                                   rtol=1e-4, atol=1e-5)

    print("KERNEL_OK")
</pallas_src>

<mosaic_0001>
module attributes {stable_mosaic.version = 11 : i64} {
  func.func @_fused_loss_kernel(%arg0: i32, %arg1: i32, %arg2: memref<2x4x8x128xf32, #tpu.memory_space<vmem>>, %arg3: memref<2x2x8x128xf32, #tpu.memory_space<vmem>>, %arg4: memref<2x3x8x128xf32, #tpu.memory_space<vmem>>, %arg5: memref<2x3x8x128xf32, #tpu.memory_space<vmem>>, %arg6: memref<1x16x8x128xf32, #tpu.memory_space<vmem>>, %arg7: memref<1x3x8x128xf32, #tpu.memory_space<vmem>>) attributes {dimension_semantics = [#tpu.dimension_semantics<parallel>, #tpu.dimension_semantics<arbitrary>], iteration_bounds = array<i64: 1, 1>, scalar_prefetch = 0 : i64, scratch_operands = 0 : i64, tpu.core_type = #tpu.core_type<tc>, window_params = [{transform_indices = @transform_0, window_bounds = array<i64: 2, 4, 8, 128>}, {transform_indices = @transform_1, window_bounds = array<i64: 2, 2, 8, 128>}, {transform_indices = @transform_2, window_bounds = array<i64: 2, 3, 8, 128>}, {transform_indices = @transform_3, window_bounds = array<i64: 2, 3, 8, 128>}, {transform_indices = @transform_4, window_bounds = array<i64: 1, 16, 8, 128>}, {transform_indices = @transform_5, window_bounds = array<i64: 1, 3, 8, 128>}]} {
    %c0_i32 = arith.constant 0 : i32
    %0 = arith.cmpi eq, %arg1, %c0_i32 : i32
    %1 = arith.extui %0 : i1 to i32
    %c0_i32_0 = arith.constant 0 : i32
    %2 = arith.cmpi ne, %1, %c0_i32_0 : i32
    scf.if %2 {
      %cst = arith.constant 0.000000e+00 : f32
      %8 = vector.broadcast %cst : f32 to vector<1x16x8x128xf32>
      %c0 = arith.constant 0 : index
      %c0_3 = arith.constant 0 : index
      %c0_4 = arith.constant 0 : index
      %c0_5 = arith.constant 0 : index
      %9 = vector.load %arg6[%c0, %c0_3, %c0_4, %c0_5] : memref<1x16x8x128xf32, #tpu.memory_space<vmem>>, vector<1x16x8x128xf32>
      tpu.vector_store %arg6[%c0, %c0_3, %c0_4, %c0_5], %8 {strides = array<i32>} : memref<1x16x8x128xf32, #tpu.memory_space<vmem>>, vector<1x16x8x128xf32>,
      %cst_6 = arith.constant 0.000000e+00 : f32
      %10 = vector.broadcast %cst_6 : f32 to vector<1x3x8x128xf32>
      %c0_7 = arith.constant 0 : index
      %c0_8 = arith.constant 0 : index
      %c0_9 = arith.constant 0 : index
      %c0_10 = arith.constant 0 : index
      %11 = vector.load %arg7[%c0_7, %c0_8, %c0_9, %c0_10] : memref<1x3x8x128xf32, #tpu.memory_space<vmem>>, vector<1x3x8x128xf32>
      tpu.vector_store %arg7[%c0_7, %c0_8, %c0_9, %c0_10], %10 {strides = array<i32>} : memref<1x3x8x128xf32, #tpu.memory_space<vmem>>, vector<1x3x8x128xf32>,
    } else {
    }
    %c1_i32 = arith.constant 1 : i32
    %3 = arith.muli %arg0, %c1_i32 : i32
    %4 = arith.addi %3, %arg1 : i32
    %c1_i32_1 = arith.constant 1 : i32
    %5 = arith.cmpi slt, %4, %c1_i32_1 : i32
    %6 = arith.extui %5 : i1 to i32
    %c0_i32_2 = arith.constant 0 : i32
    %7 = arith.cmpi ne, %6, %c0_i32_2 : i32
    scf.if %7 {
      %c0 = arith.constant 0 : index
      %c0_3 = arith.constant 0 : index
      %c0_4 = arith.constant 0 : index
      %c0_5 = arith.constant 0 : index
      %8 = vector.load %arg3[%c0, %c0_3, %c0_4, %c0_5] : memref<2x2x8x128xf32, #tpu.memory_space<vmem>>, vector<2x1x8x128xf32>
      %9 = vector.shape_cast %8 : vector<2x1x8x128xf32> to vector<2x8x128xf32>
      %c0_6 = arith.constant 0 : index
      %c0_7 = arith.constant 0 : index
      %c0_8 = arith.constant 0 : index
      %c0_9 = arith.constant 0 : index
      %10 = vector.load %arg2[%c0_6, %c0_7, %c0_8, %c0_9] : memref<2x4x8x128xf32, #tpu.memory_space<vmem>>, vector<2x1x8x128xf32>
      %11 = vector.shape_cast %10 : vector<2x1x8x128xf32> to vector<2x8x128xf32>
      %cst = arith.constant 0.000000e+00 : f32
      %12 = vector.broadcast %cst : f32 to vector<2x8x128xf32>
      %13 = arith.cmpf oeq, %9, %12 : vector<2x8x128xf32>
      %14 = arith.extui %13 : vector<2x8x128xi1> to vector<2x8x128xi32>
      %15 = arith.sitofp %14 : vector<2x8x128xi32> to vector<2x8x128xf32>
      %16 = arith.negf %11 : vector<2x8x128xf32>
      %17 = math.exp %16 : vector<2x8x128xf32>
      %cst_10 = arith.constant 1.000000e+00 : f32
      %18 = vector.broadcast %cst_10 : f32 to vector<2x8x128xf32>
      %19 = arith.addf %18, %17 : vector<2x8x128xf32>
      %20 = arith.divf %18, %19 : vector<2x8x128xf32>
      %21 = math.log %11 : vector<2x8x128xf32>
      %cst_11 = arith.constant -1.000000e+02 : f32
      %22 = vector.broadcast %cst_11 : f32 to vector<2x8x128xf32>
      %23 = arith.maximumf %21, %22 : vector<2x8x128xf32>
      %cst_12 = arith.constant 1.000000e+00 : f32
      %24 = vector.broadcast %cst_12 : f32 to vector<2x8x128xf32>
      %25 = arith.subf %24, %11 : vector<2x8x128xf32>
      %26 = math.log %25 : vector<2x8x128xf32>
      %cst_13 = arith.constant -1.000000e+02 : f32
      %27 = vector.broadcast %cst_13 : f32 to vector<2x8x128xf32>
      %28 = arith.maximumf %26, %27 : vector<2x8x128xf32>
      %29 = arith.subf %23, %28 : vector<2x8x128xf32>
      %30 = arith.mulf %15, %29 : vector<2x8x128xf32>
      %31 = arith.addf %28, %30 : vector<2x8x128xf32>
      %cst_14 = arith.constant 0.000000e+00 : f32
      %32 = vector.broadcast %cst_14 : f32 to vector<2x8x128xf32>
      %33 = arith.subf %32, %31 : vector<2x8x128xf32>
      %c0_15 = arith.constant 0 : index
      %c0_16 = arith.constant 0 : index
      %c0_17 = arith.constant 0 : index
      %c0_18 = arith.constant 0 : index
      %34 = vector.load %arg6[%c0_15, %c0_16, %c0_17, %c0_18] : memref<1x16x8x128xf32, #tpu.memory_space<vmem>>, vector<1x1x8x128xf32>
      %35 = vector.shape_cast %34 : vector<1x1x8x128xf32> to vector<8x128xf32>
      %36 = arith.mulf %20, %15 : vector<2x8x128xf32>
      %37 = vector.shape_cast %36 : vector<2x8x128xf32> to vector<2x1x8x128xf32>
      %cst_19 = arith.constant dense<0.000000e+00> : vector<8x128xf32>
      %38 = vector.multi_reduction <add>, %37, %cst_19 [0, 1] : vector<2x1x8x128xf32> to vector<8x128xf32>
      %39 = arith.addf %35, %38 : vector<8x128xf32>
      %c0_20 = arith.constant 0 : index
      %c0_21 = arith.constant 0 : index
      %c0_22 = arith.constant 0 : index
      %c0_23 = arith.constant 0 : index
      %40 = vector.load %arg6[%c0_20, %c0_21, %c0_22, %c0_23] : memref<1x16x8x128xf32, #tpu.memory_space<vmem>>, vector<1x1x8x128xf32>
      %41 = vector.shape_cast %40 : vector<1x1x8x128xf32> to vector<8x128xf32>
      %42 = vector.shape_cast %39 : vector<8x128xf32> to vector<1x1x8x128xf32>
      tpu.vector_store %arg6[%c0_20, %c0_21, %c0_22, %c0_23], %42 {strides = array<i32>} : memref<1x16x8x128xf32, #tpu.memory_space<vmem>>, vector<1x1x8x128xf32>,
      %c0_24 = arith.constant 0 : index
      %c4 = arith.constant 4 : index
      %c0_25 = arith.constant 0 : index
      %c0_26 = arith.constant 0 : index
      %43 = vector.load %arg6[%c0_24, %c4, %c0_25, %c0_26] : memref<1x16x8x128xf32, #tpu.memory_space<vmem>>, vector<1x1x8x128xf32>
      %44 = vector.shape_cast %43 : vector<1x1x8x128xf32> to vector<8x128xf32>
      %45 = arith.mulf %20, %20 : vector<2x8x128xf32>
      %46 = vector.shape_cast %45 : vector<2x8x128xf32> to vector<2x1x8x128xf32>
      %cst_27 = arith.constant dense<0.000000e+00> : vector<8x128xf32>
      %47 = vector.multi_reduction <add>, %46, %cst_27 [0, 1] : vector<2x1x8x128xf32> to vector<8x128xf32>
      %48 = arith.addf %44, %47 : vector<8x128xf32>
      %c0_28 = arith.constant 0 : index
      %c4_29 = arith.constant 4 : index
      %c0_30 = arith.constant 0 : index
      %c0_31 = arith.constant 0 : index
      %49 = vector.load %arg6[%c0_28, %c4_29, %c0_30, %c0_31] : memref<1x16x8x128xf32, #tpu.memory_space<vmem>>, vector<1x1x8x128xf32>
      %50 = vector.shape_cast %49 : vector<1x1x8x128xf32> to vector<8x128xf32>
      %51 = vector.shape_cast %48 : vector<8x128xf32> to vector<1x1x8x128xf32>
      tpu.vector_store %arg6[%c0_28, %c4_29, %c0_30, %c0_31], %51 {strides = array<i32>} : memref<1x16x8x128xf32, #tpu.memory_space<vmem>>, vector<1x1x8x128xf32>,
      %c0_32 = arith.constant 0 : index
      %c8 = arith.constant 8 : index
      %c0_33 = arith.constant 0 : index
      %c0_34 = arith.constant 0 : index
      %52 = vector.load %arg6[%c0_32, %c8, %c0_33, %c0_34] : memref<1x16x8x128xf32, #tpu.memory_space<vmem>>, vector<1x1x8x128xf32>
      %53 = vector.shape_cast %52 : vector<1x1x8x128xf32> to vector<8x128xf32>
      %54 = vector.shape_cast %15 : vector<2x8x128xf32> to vector<2x1x8x128xf32>
      %cst_35 = arith.constant dense<0.000000e+00> : vector<8x128xf32>
      %55 = vector.multi_reduction <add>, %54, %cst_35 [0, 1] : vector<2x1x8x128xf32> to vector<8x128xf32>
      %56 = arith.addf %53, %55 : vector<8x128xf32>
      %c0_36 = arith.constant 0 : index
      %c8_37 = arith.constant 8 : index
      %c0_38 = arith.constant 0 : index
      %c0_39 = arith.constant 0 : index
      %57 = vector.load %arg6[%c0_36, %c8_37, %c0_38, %c0_39] : memref<1x16x8x128xf32, #tpu.memory_space<vmem>>, vector<1x1x8x128xf32>
      %58 = vector.shape_cast %57 : vector<1x1x8x128xf32> to vector<8x128xf32>
      %59 = vector.shape_cast %56 : vector<8x128xf32> to vector<1x1x8x128xf32>
      tpu.vector_store %arg6[%c0_36, %c8_37, %c0_38, %c0_39], %59 {strides = array<i32>} : memref<1x16x8x128xf32, #tpu.memory_space<vmem>>, vector<1x1x8x128xf32>,
      %c0_40 = arith.constant 0 : index
      %c12 = arith.constant 12 : index
      %c0_41 = arith.constant 0 : index
      %c0_42 = arith.constant 0 : index
      %60 = vector.load %arg6[%c0_40, %c12, %c0_41, %c0_42] : memref<1x16x8x128xf32, #tpu.memory_space<vmem>>, vector<1x1x8x128xf32>
      %61 = vector.shape_cast %60 : vector<1x1x8x128xf32> to vector<8x128xf32>
      %62 = vector.shape_cast %33 : vector<2x8x128xf32> to vector<2x1x8x128xf32>
      %cst_43 = arith.constant dense<0.000000e+00> : vector<8x128xf32>
      %63 = vector.multi_reduction <add>, %62, %cst_43 [0, 1] : vector<2x1x8x128xf32> to vector<8x128xf32>
      %64 = arith.addf %61, %63 : vector<8x128xf32>
      %c0_44 = arith.constant 0 : index
      %c12_45 = arith.constant 12 : index
      %c0_46 = arith.constant 0 : index
      %c0_47 = arith.constant 0 : index
      %65 = vector.load %arg6[%c0_44, %c12_45, %c0_46, %c0_47] : memref<1x16x8x128xf32, #tpu.memory_space<vmem>>, vector<1x1x8x128xf32>
      %66 = vector.shape_cast %65 : vector<1x1x8x128xf32> to vector<8x128xf32>
      %67 = vector.shape_cast %64 : vector<8x128xf32> to vector<1x1x8x128xf32>
      tpu.vector_store %arg6[%c0_44, %c12_45, %c0_46, %c0_47], %67 {strides = array<i32>} : memref<1x16x8x128xf32, #tpu.memory_space<vmem>>, vector<1x1x8x128xf32>,
      %c0_48 = arith.constant 0 : index
      %c1 = arith.constant 1 : index
      %c0_49 = arith.constant 0 : index
      %c0_50 = arith.constant 0 : index
      %68 = vector.load %arg2[%c0_48, %c1, %c0_49, %c0_50] : memref<2x4x8x128xf32, #tpu.memory_space<vmem>>, vector<2x1x8x128xf32>
      %69 = vector.shape_cast %68 : vector<2x1x8x128xf32> to vector<2x8x128xf32>
      %cst_51 = arith.constant 1.000000e+00 : f32
      %70 = vector.broadcast %cst_51 : f32 to vector<2x8x128xf32>
      %71 = arith.cmpf oeq, %9, %70 : vector<2x8x128xf32>
      %72 = arith.extui %71 : vector<2x8x128xi1> to vector<2x8x128xi32>
      %73 = arith.sitofp %72 : vector<2x8x128xi32> to vector<2x8x128xf32>
      %74 = arith.negf %69 : vector<2x8x128xf32>
      %75 = math.exp %74 : vector<2x8x128xf32>
      %cst_52 = arith.constant 1.000000e+00 : f32
      %76 = vector.broadcast %cst_52 : f32 to vector<2x8x128xf32>
      %77 = arith.addf %76, %75 : vector<2x8x128xf32>
      %78 = arith.divf %76, %77 : vector<2x8x128xf32>
      %79 = math.log %69 : vector<2x8x128xf32>
      %cst_53 = arith.constant -1.000000e+02 : f32
      %80 = vector.broadcast %cst_53 : f32 to vector<2x8x128xf32>
      %81 = arith.maximumf %79, %80 : vector<2x8x128xf32>
      %cst_54 = arith.constant 1.000000e+00 : f32
      %82 = vector.broadcast %cst_54 : f32 to vector<2x8x128xf32>
      %83 = arith.subf %82, %69 : vector<2x8x128xf32>
      %84 = math.log %83 : vector<2x8x128xf32>
      %cst_55 = arith.constant -1.000000e+02 : f32
      %85 = vector.broadcast %cst_55 : f32 to vector<2x8x128xf32>
      %86 = arith.maximumf %84, %85 : vector<2x8x128xf32>
      %87 = arith.subf %81, %86 : vector<2x8x128xf32>
      %88 = arith.mulf %73, %87 : vector<2x8x128xf32>
      %89 = arith.addf %86, %88 : vector<2x8x128xf32>
      %cst_56 = arith.constant 0.000000e+00 : f32
      %90 = vector.broadcast %cst_56 : f32 to vector<2x8x128xf32>
      %91 = arith.subf %90, %89 : vector<2x8x128xf32>
      %c0_57 = arith.constant 0 : index
      %c1_58 = arith.constant 1 : index
      %c0_59 = arith.constant 0 : index
      %c0_60 = arith.constant 0 : index
      %92 = vector.load %arg6[%c0_57, %c1_58, %c0_59, %c0_60] : memref<1x16x8x128xf32, #tpu.memory_space<vmem>>, vector<1x1x8x128xf32>
      %93 = vector.shape_cast %92 : vector<1x1x8x128xf32> to vector<8x128xf32>
      %94 = arith.mulf %78, %73 : vector<2x8x128xf32>
      %95 = vector.shape_cast %94 : vector<2x8x128xf32> to vector<2x1x8x128xf32>
      %cst_61 = arith.constant dense<0.000000e+00> : vector<8x128xf32>
      %96 = vector.multi_reduction <add>, %95, %cst_61 [0, 1] : vector<2x1x8x128xf32> to vector<8x128xf32>
      %97 = arith.addf %93, %96 : vector<8x128xf32>
      %c0_62 = arith.constant 0 : index
      %c1_63 = arith.constant 1 : index
      %c0_64 = arith.constant 0 : index
      %c0_65 = arith.constant 0 : index
      %98 = vector.load %arg6[%c0_62, %c1_63, %c0_64, %c0_65] : memref<1x16x8x128xf32, #tpu.memory_space<vmem>>, vector<1x1x8x128xf32>
      %99 = vector.shape_cast %98 : vector<1x1x8x128xf32> to vector<8x128xf32>
      %100 = vector.shape_cast %97 : vector<8x128xf32> to vector<1x1x8x128xf32>
      tpu.vector_store %arg6[%c0_62, %c1_63, %c0_64, %c0_65], %100 {strides = array<i32>} : memref<1x16x8x128xf32, #tpu.memory_space<vmem>>, vector<1x1x8x128xf32>,
      %c0_66 = arith.constant 0 : index
      %c5 = arith.constant 5 : index
      %c0_67 = arith.constant 0 : index
      %c0_68 = arith.constant 0 : index
      %101 = vector.load %arg6[%c0_66, %c5, %c0_67, %c0_68] : memref<1x16x8x128xf32, #tpu.memory_space<vmem>>, vector<1x1x8x128xf32>
      %102 = vector.shape_cast %101 : vector<1x1x8x128xf32> to vector<8x128xf32>
      %103 = arith.mulf %78, %78 : vector<2x8x128xf32>
      %104 = vector.shape_cast %103 : vector<2x8x128xf32> to vector<2x1x8x128xf32>
      %cst_69 = arith.constant dense<0.000000e+00> : vector<8x128xf32>
      %105 = vector.multi_reduction <add>, %104, %cst_69 [0, 1] : vector<2x1x8x128xf32> to vector<8x128xf32>
      %106 = arith.addf %102, %105 : vector<8x128xf32>
      %c0_70 = arith.constant 0 : index
      %c5_71 = arith.constant 5 : index
      %c0_72 = arith.constant 0 : index
      %c0_73 = arith.constant 0 : index
      %107 = vector.load %arg6[%c0_70, %c5_71, %c0_72, %c0_73] : memref<1x16x8x128xf32, #tpu.memory_space<vmem>>, vector<1x1x8x128xf32>
      %108 = vector.shape_cast %107 : vector<1x1x8x128xf32> to vector<8x128xf32>
      %109 = vector.shape_cast %106 : vector<8x128xf32> to vector<1x1x8x128xf32>
      tpu.vector_store %arg6[%c0_70, %c5_71, %c0_72, %c0_73], %109 {strides = array<i32>} : memref<1x16x8x128xf32, #tpu.memory_space<vmem>>, vector<1x1x8x128xf32>,
      %c0_74 = arith.constant 0 : index
      %c9 = arith.constant 9 : index
      %c0_75 = arith.constant 0 : index
      %c0_76 = arith.constant 0 : index
      %110 = vector.load %arg6[%c0_74, %c9, %c0_75, %c0_76] : memref<1x16x8x128xf32, #tpu.memory_space<vmem>>, vector<1x1x8x128xf32>
      %111 = vector.shape_cast %110 : vector<1x1x8x128xf32> to vector<8x128xf32>
      %112 = vector.shape_cast %73 : vector<2x8x128xf32> to vector<2x1x8x128xf32>
      %cst_77 = arith.constant dense<0.000000e+00> : vector<8x128xf32>
      %113 = vector.multi_reduction <add>, %112, %cst_77 [0, 1] : vector<2x1x8x128xf32> to vector<8x128xf32>
      %114 = arith.addf %111, %113 : vector<8x128xf32>
      %c0_78 = arith.constant 0 : index
      %c9_79 = arith.constant 9 : index
      %c0_80 = arith.constant 0 : index
      %c0_81 = arith.constant 0 : index
      %115 = vector.load %arg6[%c0_78, %c9_79, %c0_80, %c0_81] : memref<1x16x8x128xf32, #tpu.memory_space<vmem>>, vector<1x1x8x128xf32>
      %116 = vector.shape_cast %115 : vector<1x1x8x128xf32> to vector<8x128xf32>
      %117 = vector.shape_cast %114 : vector<8x128xf32> to vector<1x1x8x128xf32>
      tpu.vector_store %arg6[%c0_78, %c9_79, %c0_80, %c0_81], %117 {strides = array<i32>} : memref<1x16x8x128xf32, #tpu.memory_space<vmem>>, vector<1x1x8x128xf32>,
      %c0_82 = arith.constant 0 : index
      %c13 = arith.constant 13 : index
      %c0_83 = arith.constant 0 : index
      %c0_84 = arith.constant 0 : index
      %118 = vector.load %arg6[%c0_82, %c13, %c0_83, %c0_84] : memref<1x16x8x128xf32, #tpu.memory_space<vmem>>, vector<1x1x8x128xf32>
      %119 = vector.shape_cast %118 : vector<1x1x8x128xf32> to vector<8x128xf32>
      %120 = vector.shape_cast %91 : vector<2x8x128xf32> to vector<2x1x8x128xf32>
      %cst_85 = arith.constant dense<0.000000e+00> : vector<8x128xf32>
      %121 = vector.multi_reduction <add>, %120, %cst_85 [0, 1] : vector<2x1x8x128xf32> to vector<8x128xf32>
      %122 = arith.addf %119, %121 : vector<8x128xf32>
      %c0_86 = arith.constant 0 : index
      %c13_87 = arith.constant 13 : index
      %c0_88 = arith.constant 0 : index
      %c0_89 = arith.constant 0 : index
      %123 = vector.load %arg6[%c0_86, %c13_87, %c0_88, %c0_89] : memref<1x16x8x128xf32, #tpu.memory_space<vmem>>, vector<1x1x8x128xf32>
      %124 = vector.shape_cast %123 : vector<1x1x8x128xf32> to vector<8x128xf32>
      %125 = vector.shape_cast %122 : vector<8x128xf32> to vector<1x1x8x128xf32>
      tpu.vector_store %arg6[%c0_86, %c13_87, %c0_88, %c0_89], %125 {strides = array<i32>} : memref<1x16x8x128xf32, #tpu.memory_space<vmem>>, vector<1x1x8x128xf32>,
      %c0_90 = arith.constant 0 : index
      %c2 = arith.constant 2 : index
      %c0_91 = arith.constant 0 : index
      %c0_92 = arith.constant 0 : index
      %126 = vector.load %arg2[%c0_90, %c2, %c0_91, %c0_92] : memref<2x4x8x128xf32, #tpu.memory_space<vmem>>, vector<2x1x8x128xf32>
      %127 = vector.shape_cast %126 : vector<2x1x8x128xf32> to vector<2x8x128xf32>
      %cst_93 = arith.constant 2.000000e+00 : f32
      %128 = vector.broadcast %cst_93 : f32 to vector<2x8x128xf32>
      %129 = arith.cmpf oeq, %9, %128 : vector<2x8x128xf32>
      %130 = arith.extui %129 : vector<2x8x128xi1> to vector<2x8x128xi32>
      %131 = arith.sitofp %130 : vector<2x8x128xi32> to vector<2x8x128xf32>
      %132 = arith.negf %127 : vector<2x8x128xf32>
      %133 = math.exp %132 : vector<2x8x128xf32>
      %cst_94 = arith.constant 1.000000e+00 : f32
      %134 = vector.broadcast %cst_94 : f32 to vector<2x8x128xf32>
      %135 = arith.addf %134, %133 : vector<2x8x128xf32>
      %136 = arith.divf %134, %135 : vector<2x8x128xf32>
      %137 = math.log %127 : vector<2x8x128xf32>
      %cst_95 = arith.constant -1.000000e+02 : f32
      %138 = vector.broadcast %cst_95 : f32 to vector<2x8x128xf32>
      %139 = arith.maximumf %137, %138 : vector<2x8x128xf32>
      %cst_96 = arith.constant 1.000000e+00 : f32
      %140 = vector.broadcast %cst_96 : f32 to vector<2x8x128xf32>
      %141 = arith.subf %140, %127 : vector<2x8x128xf32>
      %142 = math.log %141 : vector<2x8x128xf32>
      %cst_97 = arith.constant -1.000000e+02 : f32
      %143 = vector.broadcast %cst_97 : f32 to vector<2x8x128xf32>
      %144 = arith.maximumf %142, %143 : vector<2x8x128xf32>
      %145 = arith.subf %139, %144 : vector<2x8x128xf32>
      %146 = arith.mulf %131, %145 : vector<2x8x128xf32>
      %147 = arith.addf %144, %146 : vector<2x8x128xf32>
      %cst_98 = arith.constant 0.000000e+00 : f32
      %148 = vector.broadcast %cst_98 : f32 to vector<2x8x128xf32>
      %149 = arith.subf %148, %147 : vector<2x8x128xf32>
      %c0_99 = arith.constant 0 : index
      %c2_100 = arith.constant 2 : index
      %c0_101 = arith.constant 0 : index
      %c0_102 = arith.constant 0 : index
      %150 = vector.load %arg6[%c0_99, %c2_100, %c0_101, %c0_102] : memref<1x16x8x128xf32, #tpu.memory_space<vmem>>, vector<1x1x8x128xf32>
      %151 = vector.shape_cast %150 : vector<1x1x8x128xf32> to vector<8x128xf32>
      %152 = arith.mulf %136, %131 : vector<2x8x128xf32>
      %153 = vector.shape_cast %152 : vector<2x8x128xf32> to vector<2x1x8x128xf32>
      %cst_103 = arith.constant dense<0.000000e+00> : vector<8x128xf32>
      %154 = vector.multi_reduction <add>, %153, %cst_103 [0, 1] : vector<2x1x8x128xf32> to vector<8x128xf32>
      %155 = arith.addf %151, %154 : vector<8x128xf32>
      %c0_104 = arith.constant 0 : index
      %c2_105 = arith.constant 2 : index
      %c0_106 = arith.constant 0 : index
      %c0_107 = arith.constant 0 : index
      %156 = vector.load %arg6[%c0_104, %c2_105, %c0_106, %c0_107] : memref<1x16x8x128xf32, #tpu.memory_space<vmem>>, vector<1x1x8x128xf32>
      %157 = vector.shape_cast %156 : vector<1x1x8x128xf32> to vector<8x128xf32>
      %158 = vector.shape_cast %155 : vector<8x128xf32> to vector<1x1x8x128xf32>
      tpu.vector_store %arg6[%c0_104, %c2_105, %c0_106, %c0_107], %158 {strides = array<i32>} : memref<1x16x8x128xf32, #tpu.memory_space<vmem>>, vector<1x1x8x128xf32>,
      %c0_108 = arith.constant 0 : index
      %c6 = arith.constant 6 : index
      %c0_109 = arith.constant 0 : index
      %c0_110 = arith.constant 0 : index
      %159 = vector.load %arg6[%c0_108, %c6, %c0_109, %c0_110] : memref<1x16x8x128xf32, #tpu.memory_space<vmem>>, vector<1x1x8x128xf32>
      %160 = vector.shape_cast %159 : vector<1x1x8x128xf32> to vector<8x128xf32>
      %161 = arith.mulf %136, %136 : vector<2x8x128xf32>
      %162 = vector.shape_cast %161 : vector<2x8x128xf32> to vector<2x1x8x128xf32>
      %cst_111 = arith.constant dense<0.000000e+00> : vector<8x128xf32>
      %163 = vector.multi_reduction <add>, %162, %cst_111 [0, 1] : vector<2x1x8x128xf32> to vector<8x128xf32>
      %164 = arith.addf %160, %163 : vector<8x128xf32>
      %c0_112 = arith.constant 0 : index
      %c6_113 = arith.constant 6 : index
      %c0_114 = arith.constant 0 : index
      %c0_115 = arith.constant 0 : index
      %165 = vector.load %arg6[%c0_112, %c6_113, %c0_114, %c0_115] : memref<1x16x8x128xf32, #tpu.memory_space<vmem>>, vector<1x1x8x128xf32>
      %166 = vector.shape_cast %165 : vector<1x1x8x128xf32> to vector<8x128xf32>
      %167 = vector.shape_cast %164 : vector<8x128xf32> to vector<1x1x8x128xf32>
      tpu.vector_store %arg6[%c0_112, %c6_113, %c0_114, %c0_115], %167 {strides = array<i32>} : memref<1x16x8x128xf32, #tpu.memory_space<vmem>>, vector<1x1x8x128xf32>,
      %c0_116 = arith.constant 0 : index
      %c10 = arith.constant 10 : index
      %c0_117 = arith.constant 0 : index
      %c0_118 = arith.constant 0 : index
      %168 = vector.load %arg6[%c0_116, %c10, %c0_117, %c0_118] : memref<1x16x8x128xf32, #tpu.memory_space<vmem>>, vector<1x1x8x128xf32>
      %169 = vector.shape_cast %168 : vector<1x1x8x128xf32> to vector<8x128xf32>
      %170 = vector.shape_cast %131 : vector<2x8x128xf32> to vector<2x1x8x128xf32>
      %cst_119 = arith.constant dense<0.000000e+00> : vector<8x128xf32>
      %171 = vector.multi_reduction <add>, %170, %cst_119 [0, 1] : vector<2x1x8x128xf32> to vector<8x128xf32>
      %172 = arith.addf %169, %171 : vector<8x128xf32>
      %c0_120 = arith.constant 0 : index
      %c10_121 = arith.constant 10 : index
      %c0_122 = arith.constant 0 : index
      %c0_123 = arith.constant 0 : index
      %173 = vector.load %arg6[%c0_120, %c10_121, %c0_122, %c0_123] : memref<1x16x8x128xf32, #tpu.memory_space<vmem>>, vector<1x1x8x128xf32>
      %174 = vector.shape_cast %173 : vector<1x1x8x128xf32> to vector<8x128xf32>
      %175 = vector.shape_cast %172 : vector<8x128xf32> to vector<1x1x8x128xf32>
      tpu.vector_store %arg6[%c0_120, %c10_121, %c0_122, %c0_123], %175 {strides = array<i32>} : memref<1x16x8x128xf32, #tpu.memory_space<vmem>>, vector<1x1x8x128xf32>,
      %c0_124 = arith.constant 0 : index
      %c14 = arith.constant 14 : index
      %c0_125 = arith.constant 0 : index
      %c0_126 = arith.constant 0 : index
      %176 = vector.load %arg6[%c0_124, %c14, %c0_125, %c0_126] : memref<1x16x8x128xf32, #tpu.memory_space<vmem>>, vector<1x1x8x128xf32>
      %177 = vector.shape_cast %176 : vector<1x1x8x128xf32> to vector<8x128xf32>
      %178 = vector.shape_cast %149 : vector<2x8x128xf32> to vector<2x1x8x128xf32>
      %cst_127 = arith.constant dense<0.000000e+00> : vector<8x128xf32>
      %179 = vector.multi_reduction <add>, %178, %cst_127 [0, 1] : vector<2x1x8x128xf32> to vector<8x128xf32>
      %180 = arith.addf %177, %179 : vector<8x128xf32>
      %c0_128 = arith.constant 0 : index
      %c14_129 = arith.constant 14 : index
      %c0_130 = arith.constant 0 : index
      %c0_131 = arith.constant 0 : index
      %181 = vector.load %arg6[%c0_128, %c14_129, %c0_130, %c0_131] : memref<1x16x8x128xf32, #tpu.memory_space<vmem>>, vector<1x1x8x128xf32>
      %182 = vector.shape_cast %181 : vector<1x1x8x128xf32> to vector<8x128xf32>
      %183 = vector.shape_cast %180 : vector<8x128xf32> to vector<1x1x8x128xf32>
      tpu.vector_store %arg6[%c0_128, %c14_129, %c0_130, %c0_131], %183 {strides = array<i32>} : memref<1x16x8x128xf32, #tpu.memory_space<vmem>>, vector<1x1x8x128xf32>,
      %c0_132 = arith.constant 0 : index
      %c3 = arith.constant 3 : index
      %c0_133 = arith.constant 0 : index
      %c0_134 = arith.constant 0 : index
      %184 = vector.load %arg2[%c0_132, %c3, %c0_133, %c0_134] : memref<2x4x8x128xf32, #tpu.memory_space<vmem>>, vector<2x1x8x128xf32>
      %185 = vector.shape_cast %184 : vector<2x1x8x128xf32> to vector<2x8x128xf32>
      %cst_135 = arith.constant 3.000000e+00 : f32
      %186 = vector.broadcast %cst_135 : f32 to vector<2x8x128xf32>
      %187 = arith.cmpf oeq, %9, %186 : vector<2x8x128xf32>
      %188 = arith.extui %187 : vector<2x8x128xi1> to vector<2x8x128xi32>
      %189 = arith.sitofp %188 : vector<2x8x128xi32> to vector<2x8x128xf32>
      %190 = arith.negf %185 : vector<2x8x128xf32>
      %191 = math.exp %190 : vector<2x8x128xf32>
      %cst_136 = arith.constant 1.000000e+00 : f32
      %192 = vector.broadcast %cst_136 : f32 to vector<2x8x128xf32>
      %193 = arith.addf %192, %191 : vector<2x8x128xf32>
      %194 = arith.divf %192, %193 : vector<2x8x128xf32>
      %195 = math.log %185 : vector<2x8x128xf32>
      %cst_137 = arith.constant -1.000000e+02 : f32
      %196 = vector.broadcast %cst_137 : f32 to vector<2x8x128xf32>
      %197 = arith.maximumf %195, %196 : vector<2x8x128xf32>
      %cst_138 = arith.constant 1.000000e+00 : f32
      %198 = vector.broadcast %cst_138 : f32 to vector<2x8x128xf32>
      %199 = arith.subf %198, %185 : vector<2x8x128xf32>
      %200 = math.log %199 : vector<2x8x128xf32>
      %cst_139 = arith.constant -1.000000e+02 : f32
      %201 = vector.broadcast %cst_139 : f32 to vector<2x8x128xf32>
      %202 = arith.maximumf %200, %201 : vector<2x8x128xf32>
      %203 = arith.subf %197, %202 : vector<2x8x128xf32>
      %204 = arith.mulf %189, %203 : vector<2x8x128xf32>
      %205 = arith.addf %202, %204 : vector<2x8x128xf32>
      %cst_140 = arith.constant 0.000000e+00 : f32
      %206 = vector.broadcast %cst_140 : f32 to vector<2x8x128xf32>
      %207 = arith.subf %206, %205 : vector<2x8x128xf32>
      %c0_141 = arith.constant 0 : index
      %c3_142 = arith.constant 3 : index
      %c0_143 = arith.constant 0 : index
      %c0_144 = arith.constant 0 : index
      %208 = vector.load %arg6[%c0_141, %c3_142, %c0_143, %c0_144] : memref<1x16x8x128xf32, #tpu.memory_space<vmem>>, vector<1x1x8x128xf32>
      %209 = vector.shape_cast %208 : vector<1x1x8x128xf32> to vector<8x128xf32>
      %210 = arith.mulf %194, %189 : vector<2x8x128xf32>
      %211 = vector.shape_cast %210 : vector<2x8x128xf32> to vector<2x1x8x128xf32>
      %cst_145 = arith.constant dense<0.000000e+00> : vector<8x128xf32>
      %212 = vector.multi_reduction <add>, %211, %cst_145 [0, 1] : vector<2x1x8x128xf32> to vector<8x128xf32>
      %213 = arith.addf %209, %212 : vector<8x128xf32>
      %c0_146 = arith.constant 0 : index
      %c3_147 = arith.constant 3 : index
      %c0_148 = arith.constant 0 : index
      %c0_149 = arith.constant 0 : index
      %214 = vector.load %arg6[%c0_146, %c3_147, %c0_148, %c0_149] : memref<1x16x8x128xf32, #tpu.memory_space<vmem>>, vector<1x1x8x128xf32>
      %215 = vector.shape_cast %214 : vector<1x1x8x128xf32> to vector<8x128xf32>
      %216 = vector.shape_cast %213 : vector<8x128xf32> to vector<1x1x8x128xf32>
      tpu.vector_store %arg6[%c0_146, %c3_147, %c0_148, %c0_149], %216 {strides = array<i32>} : memref<1x16x8x128xf32, #tpu.memory_space<vmem>>, vector<1x1x8x128xf32>,
      %c0_150 = arith.constant 0 : index
      %c7 = arith.constant 7 : index
      %c0_151 = arith.constant 0 : index
      %c0_152 = arith.constant 0 : index
      %217 = vector.load %arg6[%c0_150, %c7, %c0_151, %c0_152] : memref<1x16x8x128xf32, #tpu.memory_space<vmem>>, vector<1x1x8x128xf32>
      %218 = vector.shape_cast %217 : vector<1x1x8x128xf32> to vector<8x128xf32>
      %219 = arith.mulf %194, %194 : vector<2x8x128xf32>
      %220 = vector.shape_cast %219 : vector<2x8x128xf32> to vector<2x1x8x128xf32>
      %cst_153 = arith.constant dense<0.000000e+00> : vector<8x128xf32>
      %221 = vector.multi_reduction <add>, %220, %cst_153 [0, 1] : vector<2x1x8x128xf32> to vector<8x128xf32>
      %222 = arith.addf %218, %221 : vector<8x128xf32>
      %c0_154 = arith.constant 0 : index
      %c7_155 = arith.constant 7 : index
      %c0_156 = arith.constant 0 : index
      %c0_157 = arith.constant 0 : index
      %223 = vector.load %arg6[%c0_154, %c7_155, %c0_156, %c0_157] : memref<1x16x8x128xf32, #tpu.memory_space<vmem>>, vector<1x1x8x128xf32>
      %224 = vector.shape_cast %223 : vector<1x1x8x128xf32> to vector<8x128xf32>
      %225 = vector.shape_cast %222 : vector<8x128xf32> to vector<1x1x8x128xf32>
      tpu.vector_store %arg6[%c0_154, %c7_155, %c0_156, %c0_157], %225 {strides = array<i32>} : memref<1x16x8x128xf32, #tpu.memory_space<vmem>>, vector<1x1x8x128xf32>,
      %c0_158 = arith.constant 0 : index
      %c11 = arith.constant 11 : index
      %c0_159 = arith.constant 0 : index
      %c0_160 = arith.constant 0 : index
      %226 = vector.load %arg6[%c0_158, %c11, %c0_159, %c0_160] : memref<1x16x8x128xf32, #tpu.memory_space<vmem>>, vector<1x1x8x128xf32>
      %227 = vector.shape_cast %226 : vector<1x1x8x128xf32> to vector<8x128xf32>
      %228 = vector.shape_cast %189 : vector<2x8x128xf32> to vector<2x1x8x128xf32>
      %cst_161 = arith.constant dense<0.000000e+00> : vector<8x128xf32>
      %229 = vector.multi_reduction <add>, %228, %cst_161 [0, 1] : vector<2x1x8x128xf32> to vector<8x128xf32>
      %230 = arith.addf %227, %229 : vector<8x128xf32>
      %c0_162 = arith.constant 0 : index
      %c11_163 = arith.constant 11 : index
      %c0_164 = arith.constant 0 : index
      %c0_165 = arith.constant 0 : index
      %231 = vector.load %arg6[%c0_162, %c11_163, %c0_164, %c0_165] : memref<1x16x8x128xf32, #tpu.memory_space<vmem>>, vector<1x1x8x128xf32>
      %232 = vector.shape_cast %231 : vector<1x1x8x128xf32> to vector<8x128xf32>
      %233 = vector.shape_cast %230 : vector<8x128xf32> to vector<1x1x8x128xf32>
      tpu.vector_store %arg6[%c0_162, %c11_163, %c0_164, %c0_165], %233 {strides = array<i32>} : memref<1x16x8x128xf32, #tpu.memory_space<vmem>>, vector<1x1x8x128xf32>,
      %c0_166 = arith.constant 0 : index
      %c15 = arith.constant 15 : index
      %c0_167 = arith.constant 0 : index
      %c0_168 = arith.constant 0 : index
      %234 = vector.load %arg6[%c0_166, %c15, %c0_167, %c0_168] : memref<1x16x8x128xf32, #tpu.memory_space<vmem>>, vector<1x1x8x128xf32>
      %235 = vector.shape_cast %234 : vector<1x1x8x128xf32> to vector<8x128xf32>
      %236 = vector.shape_cast %207 : vector<2x8x128xf32> to vector<2x1x8x128xf32>
      %cst_169 = arith.constant dense<0.000000e+00> : vector<8x128xf32>
      %237 = vector.multi_reduction <add>, %236, %cst_169 [0, 1] : vector<2x1x8x128xf32> to vector<8x128xf32>
      %238 = arith.addf %235, %237 : vector<8x128xf32>
      %c0_170 = arith.constant 0 : index
      %c15_171 = arith.constant 15 : index
      %c0_172 = arith.constant 0 : index
      %c0_173 = arith.constant 0 : index
      %239 = vector.load %arg6[%c0_170, %c15_171, %c0_172, %c0_173] : memref<1x16x8x128xf32, #tpu.memory_space<vmem>>, vector<1x1x8x128xf32>
      %240 = vector.shape_cast %239 : vector<1x1x8x128xf32> to vector<8x128xf32>
      %241 = vector.shape_cast %238 : vector<8x128xf32> to vector<1x1x8x128xf32>
      tpu.vector_store %arg6[%c0_170, %c15_171, %c0_172, %c0_173], %241 {strides = array<i32>} : memref<1x16x8x128xf32, #tpu.memory_space<vmem>>, vector<1x1x8x128xf32>,
      %cst_174 = arith.constant 0.000000e+00 : f32
      %242 = vector.broadcast %cst_174 : f32 to vector<2x8x128xf32>
      %243 = arith.cmpf ogt, %9, %242 : vector<2x8x128xf32>
      %244 = arith.extui %243 : vector<2x8x128xi1> to vector<2x8x128xi32>
      %245 = arith.sitofp %244 : vector<2x8x128xi32> to vector<2x8x128xf32>
      %cst_175 = arith.constant 0.000000e+00 : f32
      %246 = vector.broadcast %cst_175 : f32 to vector<2x8x128xf32>
      %cst_176 = arith.constant 0.000000e+00 : f32
      %247 = vector.broadcast %cst_176 : f32 to vector<2x8x128xf32>
      %cst_177 = arith.constant 0.000000e+00 : f32
      %248 = vector.broadcast %cst_177 : f32 to vector<2x8x128xf32>
      %cst_178 = arith.constant 0.000000e+00 : f32
      %249 = vector.broadcast %cst_178 : f32 to vector<2x8x128xf32>
      %c0_179 = arith.constant 0 : index
      %c0_180 = arith.constant 0 : index
      %c0_181 = arith.constant 0 : index
      %c0_182 = arith.constant 0 : index
      %250 = vector.load %arg4[%c0_179, %c0_180, %c0_181, %c0_182] : memref<2x3x8x128xf32, #tpu.memory_space<vmem>>, vector<2x1x8x128xf32>
      %251 = vector.shape_cast %250 : vector<2x1x8x128xf32> to vector<2x8x128xf32>
      %c0_183 = arith.constant 0 : index
      %c0_184 = arith.constant 0 : index
      %c0_185 = arith.constant 0 : index
      %c0_186 = arith.constant 0 : index
      %252 = vector.load %arg5[%c0_183, %c0_184, %c0_185, %c0_186] : memref<2x3x8x128xf32, #tpu.memory_space<vmem>>, vector<2x1x8x128xf32>
      %253 = vector.shape_cast %252 : vector<2x1x8x128xf32> to vector<2x8x128xf32>
      %254 = arith.subf %251, %253 : vector<2x8x128xf32>
      %255 = math.absf %254 : vector<2x8x128xf32>
      %cst_187 = arith.constant 1.000000e+00 : f32
      %256 = vector.broadcast %cst_187 : f32 to vector<2x8x128xf32>
      %257 = arith.cmpf olt, %255, %256 : vector<2x8x128xf32>
      %cst_188 = arith.constant 5.000000e-01 : f32
      %258 = vector.broadcast %cst_188 : f32 to vector<2x8x128xf32>
      %259 = arith.mulf %258, %254 : vector<2x8x128xf32>
      %260 = arith.mulf %259, %254 : vector<2x8x128xf32>
      %cst_189 = arith.constant 5.000000e-01 : f32
      %261 = vector.broadcast %cst_189 : f32 to vector<2x8x128xf32>
      %262 = arith.subf %255, %261 : vector<2x8x128xf32>
      %263 = arith.select %257, %260, %262 : vector<2x8x128xi1>, vector<2x8x128xf32>
      %264 = arith.addf %246, %263 : vector<2x8x128xf32>
      %265 = arith.mulf %251, %251 : vector<2x8x128xf32>
      %266 = arith.addf %247, %265 : vector<2x8x128xf32>
      %267 = arith.mulf %253, %253 : vector<2x8x128xf32>
      %268 = arith.addf %248, %267 : vector<2x8x128xf32>
      %269 = arith.mulf %251, %253 : vector<2x8x128xf32>
      %270 = arith.addf %249, %269 : vector<2x8x128xf32>
      %c0_190 = arith.constant 0 : index
      %c1_191 = arith.constant 1 : index
      %c0_192 = arith.constant 0 : index
      %c0_193 = arith.constant 0 : index
      %271 = vector.load %arg4[%c0_190, %c1_191, %c0_192, %c0_193] : memref<2x3x8x128xf32, #tpu.memory_space<vmem>>, vector<2x1x8x128xf32>
      %272 = vector.shape_cast %271 : vector<2x1x8x128xf32> to vector<2x8x128xf32>
      %c0_194 = arith.constant 0 : index
      %c1_195 = arith.constant 1 : index
      %c0_196 = arith.constant 0 : index
      %c0_197 = arith.constant 0 : index
      %273 = vector.load %arg5[%c0_194, %c1_195, %c0_196, %c0_197] : memref<2x3x8x128xf32, #tpu.memory_space<vmem>>, vector<2x1x8x128xf32>
      %274 = vector.shape_cast %273 : vector<2x1x8x128xf32> to vector<2x8x128xf32>
      %275 = arith.subf %272, %274 : vector<2x8x128xf32>
      %276 = math.absf %275 : vector<2x8x128xf32>
      %cst_198 = arith.constant 1.000000e+00 : f32
      %277 = vector.broadcast %cst_198 : f32 to vector<2x8x128xf32>
      %278 = arith.cmpf olt, %276, %277 : vector<2x8x128xf32>
      %cst_199 = arith.constant 5.000000e-01 : f32
      %279 = vector.broadcast %cst_199 : f32 to vector<2x8x128xf32>
      %280 = arith.mulf %279, %275 : vector<2x8x128xf32>
      %281 = arith.mulf %280, %275 : vector<2x8x128xf32>
      %cst_200 = arith.constant 5.000000e-01 : f32
      %282 = vector.broadcast %cst_200 : f32 to vector<2x8x128xf32>
      %283 = arith.subf %276, %282 : vector<2x8x128xf32>
      %284 = arith.select %278, %281, %283 : vector<2x8x128xi1>, vector<2x8x128xf32>
      %285 = arith.addf %264, %284 : vector<2x8x128xf32>
      %286 = arith.mulf %272, %272 : vector<2x8x128xf32>
      %287 = arith.addf %266, %286 : vector<2x8x128xf32>
      %288 = arith.mulf %274, %274 : vector<2x8x128xf32>
      %289 = arith.addf %268, %288 : vector<2x8x128xf32>
      %290 = arith.mulf %272, %274 : vector<2x8x128xf32>
      %291 = arith.addf %270, %290 : vector<2x8x128xf32>
      %c0_201 = arith.constant 0 : index
      %c2_202 = arith.constant 2 : index
      %c0_203 = arith.constant 0 : index
      %c0_204 = arith.constant 0 : index
      %292 = vector.load %arg4[%c0_201, %c2_202, %c0_203, %c0_204] : memref<2x3x8x128xf32, #tpu.memory_space<vmem>>, vector<2x1x8x128xf32>
      %293 = vector.shape_cast %292 : vector<2x1x8x128xf32> to vector<2x8x128xf32>
      %c0_205 = arith.constant 0 : index
      %c2_206 = arith.constant 2 : index
      %c0_207 = arith.constant 0 : index
      %c0_208 = arith.constant 0 : index
      %294 = vector.load %arg5[%c0_205, %c2_206, %c0_207, %c0_208] : memref<2x3x8x128xf32, #tpu.memory_space<vmem>>, vector<2x1x8x128xf32>
      %295 = vector.shape_cast %294 : vector<2x1x8x128xf32> to vector<2x8x128xf32>
      %296 = arith.subf %293, %295 : vector<2x8x128xf32>
      %297 = math.absf %296 : vector<2x8x128xf32>
      %cst_209 = arith.constant 1.000000e+00 : f32
      %298 = vector.broadcast %cst_209 : f32 to vector<2x8x128xf32>
      %299 = arith.cmpf olt, %297, %298 : vector<2x8x128xf32>
      %cst_210 = arith.constant 5.000000e-01 : f32
      %300 = vector.broadcast %cst_210 : f32 to vector<2x8x128xf32>
      %301 = arith.mulf %300, %296 : vector<2x8x128xf32>
      %302 = arith.mulf %301, %296 : vector<2x8x128xf32>
      %cst_211 = arith.constant 5.000000e-01 : f32
      %303 = vector.broadcast %cst_211 : f32 to vector<2x8x128xf32>
      %304 = arith.subf %297, %303 : vector<2x8x128xf32>
      %305 = arith.select %299, %302, %304 : vector<2x8x128xi1>, vector<2x8x128xf32>
      %306 = arith.addf %285, %305 : vector<2x8x128xf32>
      %307 = arith.mulf %293, %293 : vector<2x8x128xf32>
      %308 = arith.addf %287, %307 : vector<2x8x128xf32>
      %309 = arith.mulf %295, %295 : vector<2x8x128xf32>
      %310 = arith.addf %289, %309 : vector<2x8x128xf32>
      %311 = arith.mulf %293, %295 : vector<2x8x128xf32>
      %312 = arith.addf %291, %311 : vector<2x8x128xf32>
      %313 = math.sqrt %308 : vector<2x8x128xf32>
      %cst_212 = arith.constant 9.99999997E-7 : f32
      %314 = vector.broadcast %cst_212 : f32 to vector<2x8x128xf32>
      %315 = arith.addf %313, %314 : vector<2x8x128xf32>
      %316 = math.sqrt %310 : vector<2x8x128xf32>
      %cst_213 = arith.constant 9.99999997E-7 : f32
      %317 = vector.broadcast %cst_213 : f32 to vector<2x8x128xf32>
      %318 = arith.addf %316, %317 : vector<2x8x128xf32>
      %319 = arith.mulf %315, %318 : vector<2x8x128xf32>
      %320 = arith.divf %312, %319 : vector<2x8x128xf32>
      %c0_214 = arith.constant 0 : index
      %c0_215 = arith.constant 0 : index
      %c0_216 = arith.constant 0 : index
      %c0_217 = arith.constant 0 : index
      %321 = vector.load %arg7[%c0_214, %c0_215, %c0_216, %c0_217] : memref<1x3x8x128xf32, #tpu.memory_space<vmem>>, vector<1x1x8x128xf32>
      %322 = vector.shape_cast %321 : vector<1x1x8x128xf32> to vector<8x128xf32>
      %323 = arith.mulf %306, %245 : vector<2x8x128xf32>
      %324 = vector.shape_cast %323 : vector<2x8x128xf32> to vector<2x1x8x128xf32>
      %cst_218 = arith.constant dense<0.000000e+00> : vector<8x128xf32>
      %325 = vector.multi_reduction <add>, %324, %cst_218 [0, 1] : vector<2x1x8x128xf32> to vector<8x128xf32>
      %326 = arith.addf %322, %325 : vector<8x128xf32>
      %c0_219 = arith.constant 0 : index
      %c0_220 = arith.constant 0 : index
      %c0_221 = arith.constant 0 : index
      %c0_222 = arith.constant 0 : index
      %327 = vector.load %arg7[%c0_219, %c0_220, %c0_221, %c0_222] : memref<1x3x8x128xf32, #tpu.memory_space<vmem>>, vector<1x1x8x128xf32>
      %328 = vector.shape_cast %327 : vector<1x1x8x128xf32> to vector<8x128xf32>
      %329 = vector.shape_cast %326 : vector<8x128xf32> to vector<1x1x8x128xf32>
      tpu.vector_store %arg7[%c0_219, %c0_220, %c0_221, %c0_222], %329 {strides = array<i32>} : memref<1x3x8x128xf32, #tpu.memory_space<vmem>>, vector<1x1x8x128xf32>,
      %c0_223 = arith.constant 0 : index
      %c1_224 = arith.constant 1 : index
      %c0_225 = arith.constant 0 : index
      %c0_226 = arith.constant 0 : index
      %330 = vector.load %arg7[%c0_223, %c1_224, %c0_225, %c0_226] : memref<1x3x8x128xf32, #tpu.memory_space<vmem>>, vector<1x1x8x128xf32>
      %331 = vector.shape_cast %330 : vector<1x1x8x128xf32> to vector<8x128xf32>
      %332 = vector.shape_cast %245 : vector<2x8x128xf32> to vector<2x1x8x128xf32>
      %cst_227 = arith.constant dense<0.000000e+00> : vector<8x128xf32>
      %333 = vector.multi_reduction <add>, %332, %cst_227 [0, 1] : vector<2x1x8x128xf32> to vector<8x128xf32>
      %334 = arith.addf %331, %333 : vector<8x128xf32>
      %c0_228 = arith.constant 0 : index
      %c1_229 = arith.constant 1 : index
      %c0_230 = arith.constant 0 : index
      %c0_231 = arith.constant 0 : index
      %335 = vector.load %arg7[%c0_228, %c1_229, %c0_230, %c0_231] : memref<1x3x8x128xf32, #tpu.memory_space<vmem>>, vector<1x1x8x128xf32>
      %336 = vector.shape_cast %335 : vector<1x1x8x128xf32> to vector<8x128xf32>
      %337 = vector.shape_cast %334 : vector<8x128xf32> to vector<1x1x8x128xf32>
      tpu.vector_store %arg7[%c0_228, %c1_229, %c0_230, %c0_231], %337 {strides = array<i32>} : memref<1x3x8x128xf32, #tpu.memory_space<vmem>>, vector<1x1x8x128xf32>,
      %c0_232 = arith.constant 0 : index
      %c2_233 = arith.constant 2 : index
      %c0_234 = arith.constant 0 : index
      %c0_235 = arith.constant 0 : index
      %338 = vector.load %arg7[%c0_232, %c2_233, %c0_234, %c0_235] : memref<1x3x8x128xf32, #tpu.memory_space<vmem>>, vector<1x1x8x128xf32>
      %339 = vector.shape_cast %338 : vector<1x1x8x128xf32> to vector<8x128xf32>
      %340 = arith.mulf %320, %320 : vector<2x8x128xf32>
      %cst_236 = arith.constant 1.000000e+00 : f32
      %341 = vector.broadcast %cst_236 : f32 to vector<2x8x128xf32>
      %342 = arith.subf %341, %340 : vector<2x8x128xf32>
      %343 = arith.mulf %342, %245 : vector<2x8x128xf32>
      %344 = vector.shape_cast %343 : vector<2x8x128xf32> to vector<2x1x8x128xf32>
      %cst_237 = arith.constant dense<0.000000e+00> : vector<8x128xf32>
      %345 = vector.multi_reduction <add>, %344, %cst_237 [0, 1] : vector<2x1x8x128xf32> to vector<8x128xf32>
      %346 = arith.addf %339, %345 : vector<8x128xf32>
      %c0_238 = arith.constant 0 : index
      %c2_239 = arith.constant 2 : index
      %c0_240 = arith.constant 0 : index
      %c0_241 = arith.constant 0 : index
      %347 = vector.load %arg7[%c0_238, %c2_239, %c0_240, %c0_241] : memref<1x3x8x128xf32, #tpu.memory_space<vmem>>, vector<1x1x8x128xf32>
      %348 = vector.shape_cast %347 : vector<1x1x8x128xf32> to vector<8x128xf32>
      %349 = vector.shape_cast %346 : vector<8x128xf32> to vector<1x1x8x128xf32>
      tpu.vector_store %arg7[%c0_238, %c2_239, %c0_240, %c0_241], %349 {strides = array<i32>} : memref<1x3x8x128xf32, #tpu.memory_space<vmem>>, vector<1x1x8x128xf32>,
    } else {
    }
    return
  }
  func.func @transform_0(%arg0: i32, %arg1: i32) -> (i32, i32, i32, i32) {
    %c1_i32 = arith.constant 1 : i32
    %0 = arith.muli %arg0, %c1_i32 : i32
    %1 = arith.addi %0, %arg1 : i32
    %c0_i32 = arith.constant 0 : i32
    %2 = arith.minsi %1, %c0_i32 : i32
    %c0_i32_0 = arith.constant 0 : i32
    %c0_i32_1 = arith.constant 0 : i32
    %c0_i32_2 = arith.constant 0 : i32
    %c0_i32_3 = arith.constant 0 : i32
    return %c0_i32_0, %c0_i32_1, %2, %c0_i32_2 : i32, i32, i32, i32
  }
  func.func @transform_1(%arg0: i32, %arg1: i32) -> (i32, i32, i32, i32) {
    %c1_i32 = arith.constant 1 : i32
    %0 = arith.muli %arg0, %c1_i32 : i32
    %1 = arith.addi %0, %arg1 : i32
    %c0_i32 = arith.constant 0 : i32
    %2 = arith.minsi %1, %c0_i32 : i32
    %c0_i32_0 = arith.constant 0 : i32
    %c0_i32_1 = arith.constant 0 : i32
    %c0_i32_2 = arith.constant 0 : i32
    %c0_i32_3 = arith.constant 0 : i32
    return %c0_i32_0, %c0_i32_1, %2, %c0_i32_2 : i32, i32, i32, i32
  }
  func.func @transform_2(%arg0: i32, %arg1: i32) -> (i32, i32, i32, i32) {
    %c1_i32 = arith.constant 1 : i32
    %0 = arith.muli %arg0, %c1_i32 : i32
    %1 = arith.addi %0, %arg1 : i32
    %c0_i32 = arith.constant 0 : i32
    %2 = arith.minsi %1, %c0_i32 : i32
    %c0_i32_0 = arith.constant 0 : i32
    %c0_i32_1 = arith.constant 0 : i32
    %c0_i32_2 = arith.constant 0 : i32
    %c0_i32_3 = arith.constant 0 : i32
    return %c0_i32_0, %c0_i32_1, %2, %c0_i32_2 : i32, i32, i32, i32
  }
  func.func @transform_3(%arg0: i32, %arg1: i32) -> (i32, i32, i32, i32) {
    %c1_i32 = arith.constant 1 : i32
    %0 = arith.muli %arg0, %c1_i32 : i32
    %1 = arith.addi %0, %arg1 : i32
    %c0_i32 = arith.constant 0 : i32
    %2 = arith.minsi %1, %c0_i32 : i32
    %c0_i32_0 = arith.constant 0 : i32
    %c0_i32_1 = arith.constant 0 : i32
    %c0_i32_2 = arith.constant 0 : i32
    %c0_i32_3 = arith.constant 0 : i32
    return %c0_i32_0, %c0_i32_1, %2, %c0_i32_2 : i32, i32, i32, i32
  }
  func.func @transform_4(%arg0: i32, %arg1: i32) -> (i32, i32, i32, i32) {
    %c0_i32 = arith.constant 0 : i32
    %c0_i32_0 = arith.constant 0 : i32
    %c0_i32_1 = arith.constant 0 : i32
    %c0_i32_2 = arith.constant 0 : i32
    return %arg0, %c0_i32, %c0_i32_0, %c0_i32_1 : i32, i32, i32, i32
  }
  func.func @transform_5(%arg0: i32, %arg1: i32) -> (i32, i32, i32, i32) {
    %c0_i32 = arith.constant 0 : i32
    %c0_i32_0 = arith.constant 0 : i32
    %c0_i32_1 = arith.constant 0 : i32
    %c0_i32_2 = arith.constant 0 : i32
    return %arg0, %c0_i32, %c0_i32_0, %c0_i32_1 : i32, i32, i32, i32
  }
}

</mosaic_0001>

<bundles_post_ra>
// kernel: tpu_custom_call.1
= control target key start
LH: loop header
LB: loop body
LE: loop exit
PB: predicated region body
PF: predicated region fallthrough
CT: control target
= control target key end

     0   :  { %11 = vsyncpa [#allocation3], 0  ;;  %s1147_s0 = inlined_call_operand.hbm [shape: f32[2,4,8,128], index: 0, kind: input, shape index: {}]   ;;  %s1148_s1 = inlined_call_operand.hbm [shape: f32[2,2,8,128], index: 1, kind: input, shape index: {}]   ;;  %s1149_s2 = inlined_call_operand.hbm [shape: f32[2,3,8,128], index: 2, kind: input, shape index: {}]   ;;  %s1150_s3 = inlined_call_operand.hbm [shape: f32[2,3,8,128], index: 3, kind: input, shape index: {}]   ;;  %s1151_s4 = inlined_call_operand.hbm [shape: f32[1,16,8,128], index: 4, kind: output, shape index: {0}]   ;;  %s1152_s5 = inlined_call_operand.hbm [shape: f32[1,3,8,128], index: 5, kind: output, shape index: {1}]  }
   0x1   :  { %12 = vsyncpa [#allocation6], 0 }
   0x2   :  { %13 = vsyncpa [#allocation9], 0 }
   0x3   :  { %14 = vsyncpa [#allocation4], 0 }
   0x4   :  { %15 = vsyncpa [#allocation12], 0  ;;  %s852_s18 = smov [#allocation5]   ;;  %s853_s20 = smov [#allocation2]  }
   0x5   :  { %s43_s19 = sshll.u32 %s852_s18, 4  ;;  %s26_s21 = sshll.u32 %s853_s20, 4  ;;  %s44_s19 = int_to_ptr.vmem [resolvable:$true] %s43_s19  ;;  %s27_s21 = int_to_ptr.vmem [resolvable:$true] %s26_s21 }
   0x6   :  { %s730_s22 = scalar_lea.vmem %s44_s19, 512  ;;  %p735_p1 = scmp.lt.s32.totalorder %s44_s19, %s44_s19 }
   0x7   :  { %p731_p0 = scmp.ne.s32.totalorder %s44_s19, %s730_s22  ;;  %p736_p2 = scmp.lt.s32.totalorder %s730_s22, %s730_s22 }
   0x9   :  { %p737_p3 = por %p736_p2, %p735_p1 }
   0xb   :  { %p738_p4 = pnand %p737_p3, %p731_p0 }
   0xd   :  { %741 = shalt.err (!%p738_p4)
}
   0xe   :  { %s854_s23 = smov 128   ;;  %s855_s24 = smov 8  }
   0xf   :  { %49 = dma.hbm_to_vmem [thread:$0]  %s1148_s1, 512, %s44_s19, [#allocation6], %s854_s23, %s854_s23, %s855_s24  }
  0x10   :  { %s750_s27 = scalar_lea.vmem %s27_s21, 1024  ;;  %p755_p6 = scmp.lt.s32.totalorder %s27_s21, %s27_s21 }
  0x11   :  { %p751_p5 = scmp.ne.s32.totalorder %s27_s21, %s750_s27  ;;  %p756_p7 = scmp.lt.s32.totalorder %s750_s27, %s750_s27 }
  0x13   :  { %p757_p8 = por %p756_p7, %p755_p6 }
  0x15   :  { %p758_p9 = pnand %p757_p8, %p751_p5 }
  0x17   :  { %761 = shalt.err (!%p758_p9)
}
  0x18   :  { %32 = dma.hbm_to_vmem [thread:$0]  %s1147_s0, 1024, %s27_s21, [#allocation3], %s854_s23, %s854_s23, %s855_s24  }
  0x19   :  { %s856_s30 = smov [#allocation7]   ;;  %s857_s7 = smov [#allocation8]  }
  0x1a   :  { %s60_s6 = sshll.u32 %s856_s30, 4  ;;  %s77_s8 = sshll.u32 %s857_s7, 4  ;;  %s61_s6 = int_to_ptr.vmem [resolvable:$true] %s60_s6  ;;  %s78_s8 = int_to_ptr.vmem [resolvable:$true] %s77_s8 }
  0x1b   :  { %s770_s1 = scalar_lea.vmem %s61_s6, 768  ;;  %p775_p11 = scmp.lt.s32.totalorder %s61_s6, %s61_s6 }
  0x1c   :  { %p771_p10 = scmp.ne.s32.totalorder %s61_s6, %s770_s1  ;;  %p776_p12 = scmp.lt.s32.totalorder %s770_s1, %s770_s1 }
  0x1e   :  { %p777_p13 = por %p776_p12, %p775_p11 }
  0x20   :  { %p778_p0 = pnand %p777_p13, %p771_p10 }
  0x22   :  { %781 = shalt.err (!%p778_p0)
}
  0x23   :  { %66 = dma.hbm_to_vmem [thread:$0]  %s1149_s2, 768, %s61_s6, [#allocation6], %s854_s23, %s854_s23, %s855_s24  }
  0x24   :  { %s790_s0 = scalar_lea.vmem %s78_s8, 768  ;;  %p795_p2 = scmp.lt.s32.totalorder %s78_s8, %s78_s8 }
  0x25   :  { %p791_p1 = scmp.ne.s32.totalorder %s78_s8, %s790_s0  ;;  %p796_p3 = scmp.lt.s32.totalorder %s790_s0, %s790_s0 }
  0x27   :  { %p797_p4 = por %p796_p3, %p795_p2 }
  0x29   :  { %p798_p5 = pnand %p797_p4, %p791_p1 }
  0x2b   :  { %801 = shalt.err (!%p798_p5)
}
  0x2c   :  { %83 = dma.hbm_to_vmem [thread:$0]  %s1150_s3, 768, %s78_s8, [#allocation9], %s854_s23, %s854_s23, %s855_s24  }
  0x2d   :  { %842 = dma.done.wait [#allocation3], 1024  }
  0x2e   :  { %843 = vsyncadd [#allocation3], 4294966272 }
  0x2f   :  { %844 = dma.done.wait [#allocation6], 1280  }
  0x30   :  { %845 = vsyncadd [#allocation6], 4294966016 }
  0x31   :  { %846 = dma.done.wait [#allocation9], 768  }
  0x32   :  { %847 = vsyncadd [#allocation9], 4294966528  ;;  %v915_v0 = vld [vmem:[#allocation5] sm:$0xff]  ;;  %v917_v1 = vld [vmem:[#allocation5 + $0x10] sm:$0xff]  ;;  %v858_v6 = vmov 0.0   ;;  %s859_s2 = smov [#allocation10]  }
  0x33   :  { %v138_v2 = vld [vmem:[#allocation2] sm:$0xff]  ;;  %vm140_vm0 = vcmp.eq.f32.partialorder %v915_v0, 0.0  ;;  %vm141_vm1 = vcmp.eq.f32.partialorder %v917_v1, 0.0  ;;  %v204_v5 = vld [vmem:[#allocation2 + $0x8] sm:$0xff]  ;;  %vm206_vm2 = vcmp.eq.f32.partialorder %v915_v0, 1.0  ;;  %vm207_vm3 = vcmp.eq.f32.partialorder %v917_v1, 1.0 }
  0x34   :  { %v139_v3 = vld [vmem:[#allocation2 + $0x20] sm:$0xff]  ;;  %v615_v4 = vmul.f32 -1.442695, %v138_v2  ;;  %646 = vlog2.f32 %v138_v2  ;;  %v922_v7 = vsel %vm140_vm0, 1.0, %v858_v6  ;;  %v925_v8 = vsel %vm141_vm1, 1.0, %v858_v6  ;;  %v205_v13 = vld [vmem:[#allocation2 + $0x28] sm:$0xff] }
  0x35   :  { %v616_v9 = vmul.f32 -1.442695, %v139_v3  ;;  %648 = vlog2.f32 %v139_v3  ;;  %v195_v10 = vadd.f32 %v925_v8, %v922_v7  ;;  %v164_v11 = vsub.f32 1.0, %v138_v2  ;;  %v271_v20 = vld [vmem:[#allocation2 + $0x10] sm:$0xff]  ;;  %v949_v27 = vld [vmem:[#allocation2 + $0x18] sm:$0xff]  ;;  %v966_v38 = vld [vmem:[#allocation7] sm:$0xff] }
  0x36   :  { %650 = vpow2.f32 %v615_v4  ;;  %v165_v12 = vsub.f32 1.0, %v139_v3  ;;  %v619_v14 = vmul.f32 -1.442695, %v204_v5  ;;  %v932_v15 = vsel %vm206_vm2, 1.0, %v858_v6  ;;  %v272_v22 = vld [vmem:[#allocation2 + $0x30] sm:$0xff]  ;;  %v951_v30 = vld [vmem:[#allocation2 + $0x38] sm:$0xff] }
  0x37   :  { %652 = vpow2.f32 %v616_v9  ;;  %v935_v16 = vsel %vm207_vm3, 1.0, %v858_v6  ;;  %v620_v17 = vmul.f32 -1.442695, %v205_v13  ;;  %v230_v19 = vsub.f32 1.0, %v204_v5  ;;  %197 = vst [vmem:[#allocation10 + $0x40] sm:$0xff] %v195_v10  ;;  %v968_v39 = vld [vmem:[#allocation8] sm:$0xff] }
  0x38   :  { %654 = vlog2.f32 %v164_v11  ;;  %v262_v18 = vadd.f32 %v935_v16, %v932_v15  ;;  %v231_v21 = vsub.f32 1.0, %v205_v13  ;;  %vm273_vm4 = vcmp.eq.f32.partialorder %v915_v0, 2.0  ;;  %v975_v45 = vld [vmem:[#allocation7 + $0x18] sm:$0xff]  ;;  %v977_v46 = vld [vmem:[#allocation8 + $0x18] sm:$0xff]  ;;  %s575_s3 = sshll.u32 %s859_s2, 4  ;;  %s576_s3 = int_to_ptr.vmem [resolvable:$true] %s575_s3 }
  0x39   :  { %656 = vlog2.f32 %v165_v12  ;;  %vm274_vm5 = vcmp.eq.f32.partialorder %v917_v1, 2.0  ;;  %v942_v23 = vsel %vm273_vm4, 1.0, %v858_v6  ;;  %v623_v25 = vmul.f32 -1.442695, %v271_v20  ;;  %s802_s13 = scalar_lea.vmem %s576_s3, 2048  ;;  %p807_p7 = scmp.lt.s32.totalorder %s576_s3, %s576_s3 }
  0x3a   :  { %658 = vpow2.f32 %v619_v14  ;;  %v945_v24 = vsel %vm274_vm5, 1.0, %v858_v6  ;;  %264 = vst [vmem:[#allocation10 + $0x48] sm:$0xff] %v262_v18  ;;  %v624_v28 = vmul.f32 -1.442695, %v272_v22  ;;  %v297_v29 = vsub.f32 1.0, %v271_v20  ;;  %p803_p6 = scmp.ne.s32.totalorder %s576_s3, %s802_s13  ;;  %p808_p8 = scmp.lt.s32.totalorder %s802_s13, %s802_s13 }
  0x3b   :  { %660 = vpow2.f32 %v620_v17  ;;  %v329_v26 = vadd.f32 %v945_v24, %v942_v23  ;;  %vm340_vm6 = vcmp.eq.f32.partialorder %v915_v0, 3.0  ;;  %v298_v31 = vsub.f32 1.0, %v272_v22 }
  0x3c   :  { %662 = vlog2.f32 %v204_v5  ;;  %vm341_vm7 = vcmp.eq.f32.partialorder %v917_v1, 3.0  ;;  %v956_v32 = vsel %vm340_vm6, 1.0, %v858_v6  ;;  %v627_v34 = vmul.f32 -1.442695, %v949_v27  ;;  %p809_p9 = por %p808_p8, %p807_p7 }
  0x3d   :  { %664 = vlog2.f32 %v205_v13  ;;  %v959_v33 = vsel %vm341_vm7, 1.0, %v858_v6  ;;  %331 = vst [vmem:[#allocation10 + $0x50] sm:$0xff] %v329_v26  ;;  %v628_v35 = vmul.f32 -1.442695, %v951_v30  ;;  %v364_v37 = vsub.f32 1.0, %v949_v27 }
  0x3e   :  { %666 = vlog2.f32 %v230_v19  ;;  %v396_v36 = vadd.f32 %v959_v33, %v956_v32  ;;  %vm404_vm8 = vcmp.gt.f32.partialorder %v915_v0, 0.0  ;;  %vm405_vm9 = vcmp.gt.f32.partialorder %v917_v1, 0.0  ;;  %p810_p10 = pnand %p809_p9, %p803_p6 }
  0x3f   :  { %668 = vlog2.f32 %v231_v21  ;;  %v414_v41 = vsub.f32 %v966_v38, %v968_v39  ;;  %v365_v44 = vsub.f32 1.0, %v951_v30  ;;  %v980_v49 = vsel %vm404_vm8, 1.0, %v858_v6 }
  0x40   :  { %670 = vpow2.f32 %v623_v25  ;;  %v984_v50 = vsub.f32 %v975_v45, %v977_v46  ;;  %398 = vst [vmem:[#allocation10 + $0x58] sm:$0xff] %v396_v36  ;;  %v989_v53 = vsel %vm405_vm9, 1.0, %v858_v6 }
  0x41   :  { %v647_v40 = vpop.eup %646  ;;  %672 = vpow2.f32 %v624_v28  ;;  %v416_v54 = vand.u32 2147483647, %v414_v41  ;;  %v420_v62 = vmul.f32 0.5, %v414_v41 }
  0x42   :  { %v649_v42 = vpop.eup %648  ;;  %v159_v43 = vmul.f32 0.6931472, %v647_v40  ;;  %674 = vlog2.f32 %v271_v20  ;;  %v417_v61 = vand.u32 2147483647, %v984_v50  ;;  %v421_v1 = vmul.f32 0.5, %v984_v50 }
  0x43   :  { %v651_v47 = vpop.eup %650  ;;  %v161_v48 = vmul.f32 0.6931472, %v649_v42  ;;  %676 = vlog2.f32 %v272_v22  ;;  %vm992_vm10 = vcmp.lt.f32.partialorder %v416_v54, 1.0  ;;  %v997_v6 = vmul.f32 %v420_v62, %v414_v41 }
  0x44   :  { %v653_v51 = vpop.eup %652  ;;  %v152_v52 = vadd.f32 1.0, %v651_v47  ;;  %678 = vlog2.f32 %v297_v29  ;;  %v162_v57 = vmax.f32 %v159_v43, -100.0  ;;  %v1000_v12 = vmul.f32 %v421_v1, %v984_v50 }
  0x45   :  { %v655_v55 = vpop.eup %654  ;;  %v153_v56 = vadd.f32 1.0, %v653_v51  ;;  %v163_v58 = vmax.f32 %v161_v48, -100.0  ;;  %680 = vlog2.f32 %v298_v31  ;;  %v1002_v18 = vadd.f32 -0.5, %v416_v54 }
  0x46   :  { %v657_v59 = vpop.eup %656  ;;  %682 = vrcp.f32 %v152_v52  ;;  %v167_v60 = vmul.f32 0.6931472, %v655_v55  ;;  %v1006_v22 = vadd.f32 -0.5, %v417_v61  ;;  %vm1026_vm11 = vcmp.lt.f32.partialorder %v417_v61, 1.0 }
  0x47   :  { %v659_v63 = vpop.eup %658  ;;  %684 = vrcp.f32 %v153_v56  ;;  %v169_v0 = vmul.f32 0.6931472, %v657_v59 }
  0x48   :  { %v661_v3 = vpop.eup %660  ;;  %v170_v4 = vmax.f32 %v167_v60, -100.0  ;;  %v218_v5 = vadd.f32 1.0, %v659_v63  ;;  %686 = vpow2.f32 %v627_v34 }
  0x49   :  { %v663_v9 = vpop.eup %662  ;;  %v171_v10 = vmax.f32 %v169_v0, -100.0  ;;  %v219_v11 = vadd.f32 1.0, %v661_v3  ;;  %688 = vpow2.f32 %v628_v35 }
  0x4a   :  { %v665_v13 = vpop.eup %664  ;;  %v172_v14 = vsub.f32 %v162_v57, %v170_v4  ;;  %690 = vrcp.f32 %v218_v5  ;;  %v225_v17 = vmul.f32 0.6931472, %v663_v9 }
  0x4b   :  { %v667_v19 = vpop.eup %666  ;;  %v173_v20 = vsub.f32 %v163_v58, %v171_v10  ;;  %692 = vrcp.f32 %v219_v11  ;;  %v227_v21 = vmul.f32 0.6931472, %v665_v13 }
  0x4c   :  { %v669_v25 = vpop.eup %668  ;;  %v174_v26 = vmul.f32 %v922_v7, %v172_v14  ;;  %v228_v28 = vmax.f32 %v225_v17, -100.0  ;;  %v233_v29 = vmul.f32 0.6931472, %v667_v19  ;;  %694 = vlog2.f32 %v949_v27 }
  0x4d   :  { %v671_v31 = vpop.eup %670  ;;  %v175_v34 = vmul.f32 %v925_v8, %v173_v20  ;;  %v229_v35 = vmax.f32 %v227_v21, -100.0  ;;  %v235_v36 = vmul.f32 0.6931472, %v669_v25  ;;  %696 = vlog2.f32 %v951_v30 }
  0x4e   :  { %v673_v40 = vpop.eup %672  ;;  %v176_v41 = vadd.f32 %v174_v26, %v170_v4  ;;  %v236_v42 = vmax.f32 %v233_v29, -100.0  ;;  %v285_v43 = vadd.f32 1.0, %v671_v31  ;;  %698 = vlog2.f32 %v364_v37 }
  0x4f   :  { %v675_v47 = vpop.eup %674  ;;  %v177_v48 = vadd.f32 %v175_v34, %v171_v10  ;;  %v237_v51 = vmax.f32 %v235_v36, -100.0  ;;  %v286_v52 = vadd.f32 1.0, %v673_v40  ;;  %700 = vlog2.f32 %v365_v44 }
  0x50   :  { %v677_v54 = vpop.eup %676  ;;  %v178_v55 = vsub.f32 0.0, %v176_v41  ;;  %v238_v56 = vsub.f32 %v228_v28, %v236_v42  ;;  %702 = vrcp.f32 %v285_v43  ;;  %v292_v57 = vmul.f32 0.6931472, %v675_v47 }
  0x51   :  { %v679_v58 = vpop.eup %678  ;;  %v179_v59 = vsub.f32 0.0, %v177_v48  ;;  %v239_v60 = vsub.f32 %v229_v35, %v237_v51  ;;  %704 = vrcp.f32 %v286_v52  ;;  %v294_v62 = vmul.f32 0.6931472, %v677_v54 }
  0x52   :  { %v681_v63 = vpop.eup %680  ;;  %v240_v27 = vmul.f32 %v932_v15, %v238_v56  ;;  %v295_v37 = vmax.f32 %v292_v57, -100.0  ;;  %v300_v0 = vmul.f32 0.6931472, %v679_v58  ;;  %v426_v30 = vsel %vm992_vm10, %v997_v6, %v1002_v18 }
  0x53   :  { %v683_v44 = vpop.eup %682  ;;  %v200_v1 = vadd.f32 %v179_v59, %v178_v55  ;;  %v241_v3 = vmul.f32 %v935_v16, %v239_v60  ;;  %v296_v4 = vmax.f32 %v294_v62, -100.0  ;;  %v302_v5 = vmul.f32 0.6931472, %v681_v63 }
  0x54   :  { %v685_v9 = vpop.eup %684  ;;  %v181_v10 = vmul.f32 %v683_v44, %v922_v7  ;;  %v188_v11 = vmul.f32 %v683_v44, %v683_v44  ;;  %v242_v13 = vadd.f32 %v240_v27, %v236_v42  ;;  %v303_v14 = vmax.f32 %v300_v0, -100.0 }
  0x55   :  { %v687_v17 = vpop.eup %686  ;;  %v182_v19 = vmul.f32 %v685_v9, %v925_v8  ;;  %v189_v20 = vmul.f32 %v685_v9, %v685_v9  ;;  %v243_v21 = vadd.f32 %v241_v3, %v237_v51  ;;  %v304_v29 = vmax.f32 %v302_v5, -100.0  ;;  %202 = vst [vmem:[#allocation10 + $0x60] sm:$0xff] %v200_v1 }
  0x56   :  { %v689_v26 = vpop.eup %688  ;;  %v244_v28 = vsub.f32 0.0, %v242_v13  ;;  %v305_v31 = vsub.f32 %v295_v37, %v303_v14  ;;  %v352_v34 = vadd.f32 1.0, %v687_v17  ;;  %v427_v17 = vsel %vm1026_vm11, %v1000_v12, %v1006_v22  ;;  %v1052_v22 = vld [vmem:[#allocation7 + $0x20] sm:$0xff] }
  0x57   :  { %v691_v7 = vpop.eup %690  ;;  %v183_v35 = vadd.f32 %v182_v19, %v181_v10  ;;  %v190_v36 = vadd.f32 %v189_v20, %v188_v11  ;;  %v245_v40 = vsub.f32 0.0, %v243_v21  ;;  %v353_v41 = vadd.f32 1.0, %v689_v26 }
  0x58   :  { %v693_v8 = vpop.eup %692  ;;  %v248_v42 = vmul.f32 %v691_v7, %v932_v15  ;;  %v255_v43 = vmul.f32 %v691_v7, %v691_v7  ;;  %v306_v50 = vsub.f32 %v296_v4, %v304_v29  ;;  %v307_v61 = vmul.f32 %v942_v23, %v305_v31 }
  0x59   :  { %v695_v47 = vpop.eup %694  ;;  %v249_v48 = vmul.f32 %v693_v8, %v935_v16  ;;  %v256_v51 = vmul.f32 %v693_v8, %v693_v8  ;;  %v267_v54 = vadd.f32 %v245_v40, %v244_v28  ;;  %706 = vrcp.f32 %v352_v34  ;;  %185 = vst [vmem:[#allocation10] sm:$0xff] %v183_v35  ;;  %192 = vst [vmem:[#allocation10 + $0x20] sm:$0xff] %v190_v36  ;;  %v1057_v35 = vld [vmem:[#allocation8 + $0x20] sm:$0xff] }
  0x5a   :  { %v697_v52 = vpop.eup %696  ;;  %v308_v55 = vmul.f32 %v945_v24, %v306_v50  ;;  %v309_v56 = vadd.f32 %v307_v61, %v303_v14  ;;  %708 = vrcp.f32 %v353_v41  ;;  %v359_v15 = vmul.f32 0.6931472, %v695_v47 }
  0x5b   :  { %v699_v57 = vpop.eup %698  ;;  %v250_v58 = vadd.f32 %v249_v48, %v248_v42  ;;  %v257_v59 = vadd.f32 %v256_v51, %v255_v43  ;;  %v361_v27 = vmul.f32 0.6931472, %v697_v52  ;;  %269 = vst [vmem:[#allocation10 + $0x68] sm:$0xff] %v267_v54  ;;  %v430_v19 = vmul.f32 %v966_v38, %v966_v38 }
  0x5c   :  { %v701_v60 = vpop.eup %700  ;;  %v310_v62 = vadd.f32 %v308_v55, %v304_v29  ;;  %v311_v63 = vsub.f32 0.0, %v309_v56  ;;  %v362_v16 = vmax.f32 %v359_v15, -100.0  ;;  %v367_v0 = vmul.f32 0.6931472, %v699_v57  ;;  %v1046_v29 = vld [vmem:[#allocation8 + $0x8] sm:$0xff] }
  0x5d   :  { %v703_v37 = vpop.eup %702  ;;  %v363_v5 = vmax.f32 %v361_v27, -100.0  ;;  %252 = vst [vmem:[#allocation10 + $0x8] sm:$0xff] %v250_v58  ;;  %259 = vst [vmem:[#allocation10 + $0x28] sm:$0xff] %v257_v59  ;;  %v369_v11 = vmul.f32 0.6931472, %v701_v60  ;;  %v434_v31 = vmul.f32 %v968_v39, %v968_v39  ;;  %v435_v12 = vmul.f32 %v977_v46, %v977_v46 }
  0x5e   :  { %v705_v44 = vpop.eup %704  ;;  %v315_v1 = vmul.f32 %v703_v37, %v942_v23  ;;  %v322_v3 = vmul.f32 %v703_v37, %v703_v37  ;;  %v312_v4 = vsub.f32 0.0, %v310_v62  ;;  %v370_v13 = vmax.f32 %v367_v0, -100.0 }
  0x5f   :  { %v316_v9 = vmul.f32 %v705_v44, %v945_v24  ;;  %v323_v10 = vmul.f32 %v705_v44, %v705_v44  ;;  %v431_v23 = vmul.f32 %v975_v45, %v975_v45  ;;  %v371_v26 = vmax.f32 %v369_v11, -100.0  ;;  %v1044_v24 = vld [vmem:[#allocation7 + $0x8] sm:$0xff] }
  0x60   :  { %v334_v14 = vadd.f32 %v312_v4, %v311_v63  ;;  %v372_v28 = vsub.f32 %v362_v16, %v370_v13  ;;  %v448_v25 = vsub.f32 %v1044_v24, %v1046_v29  ;;  %v449_v36 = vsub.f32 %v1052_v22, %v1057_v35  ;;  %v1086_v11 = vld [vmem:[#allocation7 + $0x28] sm:$0xff] }
  0x61   :  { %v317_v20 = vadd.f32 %v316_v9, %v315_v1  ;;  %v324_v21 = vadd.f32 %v323_v10, %v322_v3  ;;  %v373_v34 = vsub.f32 %v363_v5, %v371_v26  ;;  %v464_v8 = vmul.f32 %v1044_v24, %v1044_v24 }
  0x62   :  { %v374_v7 = vmul.f32 %v956_v32, %v372_v28  ;;  %336 = vst [vmem:[#allocation10 + $0x70] sm:$0xff] %v334_v14  ;;  %v450_v40 = vand.u32 2147483647, %v448_v25  ;;  %v454_v41 = vmul.f32 0.5, %v448_v25  ;;  %v465_v50 = vmul.f32 %v1052_v22, %v1052_v22 }
  0x63   :  { %319 = vst [vmem:[#allocation10 + $0x10] sm:$0xff] %v317_v20  ;;  %326 = vst [vmem:[#allocation10 + $0x30] sm:$0xff] %v324_v21  ;;  %v375_v42 = vmul.f32 %v959_v33, %v373_v34  ;;  %v468_v61 = vmul.f32 %v1046_v29, %v1046_v29  ;;  %v451_v47 = vand.u32 2147483647, %v449_v36  ;;  %v455_v51 = vmul.f32 0.5, %v449_v36  ;;  %v1095_v20 = vld [vmem:[#allocation8 + $0x28] sm:$0xff] }
  0x64   :  { %v376_v43 = vadd.f32 %v374_v7, %v370_v13  ;;  %vm1068_vm12 = vcmp.lt.f32.partialorder %v450_v40, 1.0  ;;  %v456_v52 = vmul.f32 %v454_v41, %v448_v25  ;;  %v633_v57 = vadd.f32 -0.5, %v450_v40  ;;  %v1088_v13 = vld [vmem:[#allocation8 + $0x10] sm:$0xff] }
  0x65   :  { %v377_v55 = vadd.f32 %v375_v42, %v371_v26  ;;  %v466_v58 = vadd.f32 %v464_v8, %v430_v19  ;;  %vm1073_vm13 = vcmp.lt.f32.partialorder %v451_v47, 1.0  ;;  %v457_v63 = vmul.f32 %v455_v51, %v449_v36 }
  0x66   :  { %v707_v54 = vpop.eup %706  ;;  %v378_v56 = vsub.f32 0.0, %v376_v43  ;;  %v634_v0 = vadd.f32 -0.5, %v451_v47  ;;  %v460_v44 = vsel %vm1068_vm12, %v456_v52, %v633_v57  ;;  %v467_v1 = vadd.f32 %v465_v50, %v431_v23 }
  0x67   :  { %v709_v59 = vpop.eup %708  ;;  %v382_v15 = vmul.f32 %v707_v54, %v956_v32  ;;  %v389_v60 = vmul.f32 %v707_v54, %v707_v54  ;;  %v379_v16 = vsub.f32 0.0, %v377_v55  ;;  %v469_v3 = vmul.f32 %v1057_v35, %v1057_v35 }
  0x68   :  { %v383_v27 = vmul.f32 %v709_v59, %v959_v33  ;;  %v390_v37 = vmul.f32 %v709_v59, %v709_v59  ;;  %v470_v4 = vadd.f32 %v468_v61, %v434_v31  ;;  %v461_v10 = vsel %vm1073_vm13, %v457_v63, %v634_v0  ;;  %v1084_v33 = vld [vmem:[#allocation7 + $0x10] sm:$0xff] }
  0x69   :  { %v401_v9 = vadd.f32 %v379_v16, %v378_v56  ;;  %v462_v14 = vadd.f32 %v460_v44, %v426_v30  ;;  %v463_v19 = vadd.f32 %v461_v10, %v427_v17  ;;  %v471_v23 = vadd.f32 %v469_v3, %v435_v12 }
  0x6a   :  { %v384_v32 = vadd.f32 %v383_v27, %v382_v15  ;;  %v391_v5 = vadd.f32 %v390_v37, %v389_v60  ;;  %v482_v21 = vsub.f32 %v1084_v33, %v1088_v13  ;;  %v483_v26 = vsub.f32 %v1086_v11, %v1095_v20 }
  0x6b   :  { %v498_v2 = vmul.f32 %v1084_v33, %v1084_v33  ;;  %v499_v6 = vmul.f32 %v1086_v11, %v1086_v11  ;;  %403 = vst [vmem:[#allocation10 + $0x78] sm:$0xff] %v401_v9  ;;  %v502_v17 = vmul.f32 %v1088_v13, %v1088_v13  ;;  %v503_v12 = vmul.f32 %v1095_v20, %v1095_v20 }
  0x6c   :  { %v484_v28 = vand.u32 2147483647, %v482_v21  ;;  %v488_v31 = vmul.f32 0.5, %v482_v21  ;;  %386 = vst [vmem:[#allocation10 + $0x18] sm:$0xff] %v384_v32  ;;  %393 = vst [vmem:[#allocation10 + $0x38] sm:$0xff] %v391_v5  ;;  %v489_v30 = vmul.f32 0.5, %v483_v26 }
  0x6d   :  { %v485_v18 = vand.u32 2147483647, %v483_v26  ;;  %v500_v36 = vadd.f32 %v498_v2, %v466_v58 }
  0x6e   :  { %vm1109_vm14 = vcmp.lt.f32.partialorder %v484_v28, 1.0  ;;  %v490_v34 = vmul.f32 %v488_v31, %v482_v21  ;;  %v635_v7 = vadd.f32 -0.5, %v484_v28 }
  0x6f   :  { %813 = shalt.err (!%p810_p10)
}
  0x70   :  { %581 = dma.vmem_to_hbm [thread:$0]  %s576_s3, 2048, %s1151_s4, [#allocation4], %s854_s23, %s854_s23, %s855_s24   ;;  %vm487_vm15 = vcmp.lt.f32.partialorder %v485_v18, 1.0  ;;  %v491_v40 = vmul.f32 %v489_v30, %v483_v26  ;;  %v636_v41 = vadd.f32 -0.5, %v485_v18  ;;  %v501_v8 = vadd.f32 %v499_v6, %v467_v1 }
  0x71   :  { %v494_v42 = vsel %vm1109_vm14, %v490_v34, %v635_v7  ;;  %v504_v43 = vadd.f32 %v502_v17, %v470_v4  ;;  %v505_v50 = vadd.f32 %v503_v12, %v471_v23  ;;  %710 = vrsqrt.f32 %v500_v36  ;;  %s860_s4 = smov [#allocation11]  }
  0x72   :  { %v495_v61 = vsel %vm487_vm15, %v491_v40, %v636_v41  ;;  %v496_v47 = vadd.f32 %v494_v42, %v462_v14  ;;  %712 = vrsqrt.f32 %v501_v8  ;;  %v556_v48 = vadd.f32 %v989_v53, %v980_v49  ;;  %s587_s16 = sshll.u32 %s860_s4, 4  ;;  %s588_s16 = int_to_ptr.vmem [resolvable:$true] %s587_s16 }
  0x73   :  { %v497_v51 = vadd.f32 %v495_v61, %v463_v19  ;;  %714 = vrsqrt.f32 %v504_v43  ;;  %vm512_vm0 = vcmp.eq.f32.partialorder %v500_v36, inf  ;;  %vm514_vm1 = vcmp.eq.f32.partialorder %v500_v36, 0.0  ;;  %s822_s17 = scalar_lea.vmem %s588_s16, 384  ;;  %p827_p12 = scmp.lt.s32.totalorder %s588_s16, %s588_s16 }
  0x74   :  { %716 = vrsqrt.f32 %v505_v50  ;;  %v549_v52 = vmul.f32 %v980_v49, %v496_v47  ;;  %558 = vst [vmem:[#allocation11 + $0x8] sm:$0xff] %v556_v48  ;;  %v515_v57 = vand.u32 2147483648, %v500_v36  ;;  %vm519_vm2 = vcmp.eq.f32.partialorder %v501_v8, inf  ;;  %p823_p11 = scmp.ne.s32.totalorder %s588_s16, %s822_s17  ;;  %p828_p13 = scmp.lt.s32.totalorder %s822_s17, %s822_s17 }
  0x75   :  { %v550_v54 = vmul.f32 %v989_v53, %v497_v51  ;;  %vm521_vm3 = vcmp.eq.f32.partialorder %v501_v8, 0.0  ;;  %v522_v15 = vand.u32 2147483648, %v501_v8  ;;  %vm528_vm4 = vcmp.eq.f32.partialorder %v504_v43, inf }
  0x76   :  { %vm530_vm5 = vcmp.eq.f32.partialorder %v504_v43, 0.0  ;;  %v531_v63 = vand.u32 2147483648, %v504_v43  ;;  %vm535_vm6 = vcmp.eq.f32.partialorder %v505_v50, inf  ;;  %v538_v0 = vand.u32 2147483648, %v505_v50  ;;  %p829_p0 = por %p828_p13, %p827_p12 }
  0x77   :  { %v551_v55 = vadd.f32 %v550_v54, %v549_v52  ;;  %vm537_vm7 = vcmp.eq.f32.partialorder %v505_v50, 0.0  ;;  %v438_v31 = vmul.f32 %v968_v39, %v966_v38  ;;  %v472_v2 = vmul.f32 %v1046_v29, %v1044_v24 }
  0x78   :  { %v439_v6 = vmul.f32 %v977_v46, %v975_v45  ;;  %v473_v18 = vmul.f32 %v1057_v35, %v1052_v22  ;;  %v506_v17 = vmul.f32 %v1088_v13, %v1084_v33  ;;  %v507_v25 = vmul.f32 %v1095_v20, %v1086_v11  ;;  %p830_p1 = pnand %p829_p0, %p823_p11 }
  0x79   :  { %553 = vst [vmem:[#allocation11] sm:$0xff] %v551_v55  ;;  %v474_v30 = vadd.f32 %v472_v2, %v438_v31 }
  0x7a   :  { %v475_v12 = vadd.f32 %v473_v18, %v439_v6 }
  0x7b   :  { %v508_v34 = vadd.f32 %v506_v17, %v474_v30 }
  0x7c   :  { %v509_v7 = vadd.f32 %v507_v25, %v475_v12 }
  0x7e   :  { %v711_v56 = vpop.eup %710 }
  0x7f   :  { %v713_v58 = vpop.eup %712  ;;  %v511_v59 = vmul.f32 %v711_v56, %v500_v36 }
  0x80   :  { %v715_v60 = vpop.eup %714  ;;  %v518_v62 = vmul.f32 %v713_v58, %v501_v8 }
  0x81   :  { %v717_v27 = vpop.eup %716  ;;  %v513_v37 = vsel %vm512_vm0, %v500_v36, %v511_v59  ;;  %v527_v16 = vmul.f32 %v715_v60, %v504_v43 }
  0x82   :  { %v516_v44 = vsel %vm514_vm1, %v515_v57, %v513_v37  ;;  %v520_v1 = vsel %vm519_vm2, %v501_v8, %v518_v62  ;;  %v534_v3 = vmul.f32 %v717_v27, %v505_v50 }
  0x83   :  { %v523_v4 = vsel %vm521_vm3, %v522_v15, %v520_v1  ;;  %v524_v32 = vadd.f32 1e-06, %v516_v44  ;;  %v529_v5 = vsel %vm528_vm4, %v504_v43, %v527_v16 }
  0x84   :  { %v525_v9 = vadd.f32 1e-06, %v523_v4  ;;  %v532_v10 = vsel %vm530_vm5, %v531_v63, %v529_v5  ;;  %v536_v14 = vsel %vm535_vm6, %v505_v50, %v534_v3 }
  0x85   :  { %v539_v19 = vsel %vm537_vm7, %v538_v0, %v536_v14  ;;  %v540_v23 = vadd.f32 1e-06, %v532_v10 }
  0x86   :  { %v541_v21 = vadd.f32 1e-06, %v539_v19 }
  0x87   :  { %v542_v26 = vmul.f32 %v540_v23, %v524_v32 }
  0x88   :  { %v543_v28 = vmul.f32 %v541_v21, %v525_v9 }
  0x89   :  { %718 = vrcp.f32 %v542_v26 }
  0x8a   :  { %720 = vrcp.f32 %v543_v28 }
  0x96   :  { %v719_v38 = vpop.eup %718 }
  0x97   :  { %v721_v39 = vpop.eup %720  ;;  %v545_v36 = vmul.f32 %v719_v38, %v508_v34 }
  0x98   :  { %v547_v24 = vmul.f32 %v721_v39, %v509_v7 }
  0x99   :  { %v561_v29 = vmul.f32 %v545_v36, %v545_v36 }
  0x9a   :  { %v562_v40 = vmul.f32 %v547_v24, %v547_v24 }
  0x9b   :  { %v563_v45 = vsub.f32 1.0, %v561_v29 }
  0x9c   :  { %v564_v46 = vsub.f32 1.0, %v562_v40 }
  0x9d   :  { %v565_v22 = vmul.f32 %v980_v49, %v563_v45 }
  0x9e   :  { %v566_v35 = vmul.f32 %v989_v53, %v564_v46 }
  0xa0   :  { %v567_v33 = vadd.f32 %v566_v35, %v565_v22 }
  0xa2   :  { %569 = vst [vmem:[#allocation11 + $0x10] sm:$0xff] %v567_v33 }
  0xa3   :  { %833 = shalt.err (!%p830_p1)
}
  0xa4   :  { %593 = dma.vmem_to_hbm [thread:$0]  %s588_s16, 384, %s1152_s5, [#allocation12], %s854_s23, %s854_s23, %s855_s24  }
  0xa5   :  { %848 = dma.done.wait [#allocation4], 2048  }
  0xa6   :  { %849 = vsyncadd [#allocation4], 4294965248 }
  0xa7   :  { %850 = dma.done.wait [#allocation12], 384  }
  0xa8   :  { %851 = vsyncadd [#allocation12], 4294966912 }
  0xa9   :  { %600 = vsyncpa [#allocation3], 1 }
  0xaa   :  { %601 = vsyncpa [#allocation6], 1 }
  0xab   :  { %602 = vsyncpa [#allocation9], 1 }
  0xac   :  { %603 = vsyncpa [#allocation4], 1 }
  0xad   :  { %604 = vsyncpa [#allocation12], 1 }

</bundles_post_ra>
